<compile_context>
chip_gen: v7x
topology: tpu7x:2x2x1
jax: 0.10.0
libtpu: 0.0.40
codegen_flags: <defaults>
</compile_context>

<pallas_src>
import functools

import jax
import jax.numpy as jnp
from jax.experimental import pallas as pl
from jax.experimental.pallas import tpu as pltpu

LN_EPS = 1e-5

FUSED_ORDER = ["w_feat", "w_yaw", "b1", "g1", "be1",
               "w2", "b2", "g2", "be2", "w_out", "b_out", "s4", "s2"]

OUT_LANES = 128


# ---------------------------------------------------------------------------
# Kernel
# ---------------------------------------------------------------------------
def _yaw_vel_kernel(hidden,
                    feat_ref, yaw_ref, rep_ref,
                    wf_ref, wy_ref, b1_ref, g1_ref, be1_ref,
                    w2_ref, b2_ref, g2_ref, be2_ref,
                    wo_ref, bo_ref, s4_ref, s2_ref,
                    out_ref):
    H = hidden

    feat = feat_ref[...]                          # [bt, C]
    yaw = yaw_ref[...]                            # [TM, 1] (batch-major rows)

    # Per-batch feature projection with the LayerNorm segment-means folded in
    # as extra columns: [bt, C] @ [C, 8H] -> [z columns (4H) | mu columns (4H)]
    proj = jnp.dot(feat, wf_ref[...], preferred_element_type=jnp.float32)

    # Replicate each batch row across its n candidates with the precomputed
    # 0/1 block-replication matrix (VMEM-resident constant).
    zext = jnp.dot(rep_ref[...], proj, preferred_element_type=jnp.float32)  # [TM, 8H]

    # Yaw candidate enters as a rank-1 update (last input feature) + bias;
    # the yaw/bias weights carry their own folded mean columns.
    zext = zext + yaw * wy_ref[...] + b1_ref[...]

    # Segment LayerNorm (segments = [h1_prob | h1_mean | sc_prob | sc_mean]):
    # means came pre-folded; only the variance matmul remains.
    z, mu = zext[:, :4 * H], zext[:, 4 * H:]
    c = z - mu
    var = jnp.dot(c * c, s4_ref[...], preferred_element_type=jnp.float32)
    zln = c * jax.lax.rsqrt(var + LN_EPS) * g1_ref[...] + be1_ref[...]

    h = jnp.maximum(zln[:, :2 * H], 0.0)          # ReLU branch, both heads
    sc = zln[:, 2 * H:]                           # LayerNorm shortcut, both heads

    # Block-diagonal second projection with the LN mean fold:
    # [TM, 2H] @ [2H, 4H] -> [h2 (2H) | mu2 (2H)].
    h2ext = jnp.dot(h, w2_ref[...], preferred_element_type=jnp.float32) + b2_ref[...]
    h2, mu2 = h2ext[:, :2 * H], h2ext[:, 2 * H:]
    c2 = h2 - mu2
    var2 = jnp.dot(c2 * c2, s2_ref[...], preferred_element_type=jnp.float32)
    h2ln = c2 * jax.lax.rsqrt(var2 + LN_EPS) * g2_ref[...] + be2_ref[...]

    m = jnp.maximum(h2ln + sc, 0.0)               # [TM, 2H]

    # Lane-dense output tile: col 0 = prob logits, col 1 = mean, rest zero.
    out_ref[...] = (jnp.dot(m, wo_ref[...], preferred_element_type=jnp.float32)
                    + bo_ref[...])


# ---------------------------------------------------------------------------
# Host-side parameter fusion
# ---------------------------------------------------------------------------
def _seg_avg_matrix(width, seg):
    idx = jnp.arange(width)
    same = (idx[:, None] // seg) == (idx[None, :] // seg)
    return same.astype(jnp.float32) / seg


def _fuse_params(params, in_channels, hidden):
    C, H = in_channels, hidden
    zhh = jnp.zeros((H, H), jnp.float32)
    zh1 = jnp.zeros((H, 1), jnp.float32)
    s4 = _seg_avg_matrix(4 * H, H)
    s2 = _seg_avg_matrix(2 * H, H)

    # first projection, column layout [h1_prob | h1_mean | sc_prob | sc_mean]
    w_cat = jnp.concatenate([params["W1"][0], params["W1"][1],
                             params["Ws"][0], params["Ws"][1]], axis=1)   # [D, 4H]
    w_feat = w_cat[:C]                                                    # [C, 4H]
    w_yaw = w_cat[C:C + 1]                                                # [1, 4H]
    b1 = jnp.concatenate([params["b1"][0], params["b1"][1],
                          params["bs"][0], params["bs"][1]], axis=-1)     # [1, 4H]

    # block-diagonal second projection [2H, 2H]
    w2 = jnp.concatenate(
        [jnp.concatenate([params["W2"][0], zhh], axis=1),
         jnp.concatenate([zhh, params["W2"][1]], axis=1)], axis=0)
    b2 = jnp.concatenate([params["b2"][0], params["b2"][1]], axis=-1)     # [1, 2H]

    # fused final Linear(hidden, 1) for both heads -> [2H, 2]
    w_out = jnp.concatenate(
        [jnp.concatenate([params["Wf"][0], zh1], axis=1),
         jnp.concatenate([zh1, params["Wf"][1]], axis=1)], axis=0)
    b_out = jnp.concatenate([params["bf"][0], params["bf"][1]], axis=-1)  # [1, 2]

    fused = {
        # LayerNorm mean fold: append w @ seg_avg columns so each projection
        # emits [values | per-segment means] in one MXU pass.
        "w_feat": jnp.concatenate([w_feat, w_feat @ s4], axis=1),         # [C, 8H]
        "w_yaw": jnp.concatenate([w_yaw, w_yaw @ s4], axis=1),            # [1, 8H]
        "b1": jnp.concatenate([b1, b1 @ s4], axis=-1),                    # [1, 8H]
        "g1": jnp.concatenate([params["g1"][0], params["g1"][1],
                               params["gs"][0], params["gs"][1]], axis=-1),
        "be1": jnp.concatenate([params["be1"][0], params["be1"][1],
                                params["bes"][0], params["bes"][1]], axis=-1),
        "w2": jnp.concatenate([w2, w2 @ s2], axis=1),                     # [2H, 4H]
        "b2": jnp.concatenate([b2, b2 @ s2], axis=-1),                    # [1, 4H]
        "g2": jnp.concatenate([params["g2"][0], params["g2"][1]], axis=-1),
        "be2": jnp.concatenate([params["be2"][0], params["be2"][1]], axis=-1),
        # padded to a full 128-lane output tile -> unmasked vector stores
        "w_out": jnp.pad(w_out, ((0, 0), (0, OUT_LANES - 2))),            # [2H, 128]
        "b_out": jnp.pad(b_out, ((0, 0), (0, OUT_LANES - 2))),            # [1, 128]
        # segment-averaging matrices (only variance matmuls remain in-kernel)
        "s4": s4,
        "s2": s2,
    }
    return fused


# ---------------------------------------------------------------------------
# Forward wrapper
# ---------------------------------------------------------------------------
def yaw_vel_pred_forward(feat_in, yaw_candidate, params, *, rows_per_step=1024):
    """feat_in: [B, 1, C], yaw_candidate: [B, n, 1] -> (prob [B, n], mean [B, n, 1])."""
    assert feat_in.ndim == 3, "[YawPred]: Error input feature dimension"
    B, _, C = feat_in.shape
    _, n, last = yaw_candidate.shape
    assert last == 1
    H = params["W1"].shape[-1]

    fused = _fuse_params(params, C, H)

    def _round_up(x, m):
        return ((x + m - 1) // m) * m

    # Batch tiling: bt batch elements (= bt*n rows) per grid step.
    #   * bt multiple of 8 (or == b_pad) to satisfy the (8, 128) block rule.
    #   * at least 2 "parallel" grid steps whenever B > 1 so both v7x
    #     TensorCores get work.
    #   * capped by rows_per_step so TM rows amortize per-step overhead while
    #     staying far below the VMEM limit.
    bt_cap = max(8, ((rows_per_step // max(n, 1)) // 8) * 8)
    if B <= 1:
        bt = max(B, 1)
        num_steps = 1
    else:
        bt = min(bt_cap, _round_up(-(-B // 2), 8))
        num_steps = max(2, -(-B // bt))
    b_pad = num_steps * bt
    TM = bt * n

    feat2 = feat_in[:, 0, :].astype(jnp.float32)                 # [B, C]
    yaw2 = yaw_candidate.reshape(B * n, 1).astype(jnp.float32)   # [B*n, 1] batch-major
    if b_pad != B:
        feat2 = jnp.pad(feat2, ((0, b_pad - B), (0, 0)))
        yaw2 = jnp.pad(yaw2, ((0, (b_pad - B) * n), (0, 0)))

    # 0/1 block-replication matrix: candidate row r belongs to batch r // n.
    rep = (jnp.arange(TM)[:, None] // n
           == jnp.arange(bt)[None, :]).astype(jnp.float32)       # [TM, bt]

    def const_spec(shape):
        nd = len(shape)
        return pl.BlockSpec(shape, lambda i, _nd=nd: (0,) * _nd)

    in_specs = [pl.BlockSpec((bt, C), lambda i: (i, 0)),          # feat
                pl.BlockSpec((TM, 1), lambda i: (i, 0)),          # yaw column
                const_spec((TM, bt))]                             # replication matrix
    in_specs += [const_spec(tuple(fused[k].shape)) for k in FUSED_ORDER]
    out_specs = pl.BlockSpec((TM, OUT_LANES), lambda i: (i, 0))

    kernel = functools.partial(_yaw_vel_kernel, H)
    out = pl.pallas_call(
        kernel,
        out_shape=jax.ShapeDtypeStruct((b_pad * n, OUT_LANES), jnp.float32),
        grid_spec=pltpu.PrefetchScalarGridSpec(
            num_scalar_prefetch=0,
            grid=(num_steps,),
            in_specs=in_specs,
            out_specs=out_specs,
        ),
        compiler_params=pltpu.CompilerParams(
            dimension_semantics=("parallel",)),
    )(feat2, yaw2, rep, *[fused[k] for k in FUSED_ORDER])

    out = out[:B * n, :2].reshape(B, n, 2)
    logits = out[..., 0]                          # [B, n]
    prob = jax.nn.softmax(logits, axis=-1)        # softmax over candidates (tiny)
    mean = out[..., 1:2]                          # [B, n, 1]
    return prob, mean


# ---------------------------------------------------------------------------
# Parameters + pure-JAX reference (mirrors the PyTorch module)
# ---------------------------------------------------------------------------
def init_params(key, in_channels, hidden_dim):
    """Deterministic synthetic parameters, stacked for the 2 heads (prob, mean)."""
    D = in_channels + 1
    H = hidden_dim
    ks = jax.random.split(key, 8)
    return {
        "W1": 0.1 * jax.random.normal(ks[0], (2, D, H), jnp.float32),
        "b1": 0.01 * jax.random.normal(ks[1], (2, 1, H), jnp.float32),
        "g1": jnp.ones((2, 1, H), jnp.float32),
        "be1": jnp.zeros((2, 1, H), jnp.float32),
        "W2": 0.1 * jax.random.normal(ks[2], (2, H, H), jnp.float32),
        "b2": 0.01 * jax.random.normal(ks[3], (2, 1, H), jnp.float32),
        "g2": jnp.ones((2, 1, H), jnp.float32),
        "be2": jnp.zeros((2, 1, H), jnp.float32),
        "Ws": 0.1 * jax.random.normal(ks[4], (2, D, H), jnp.float32),
        "bs": 0.01 * jax.random.normal(ks[5], (2, 1, H), jnp.float32),
        "gs": jnp.ones((2, 1, H), jnp.float32),
        "bes": jnp.zeros((2, 1, H), jnp.float32),
        "Wf": 0.1 * jax.random.normal(ks[6], (2, H, 1), jnp.float32),
        "bf": 0.01 * jax.random.normal(ks[7], (2, 1, 1), jnp.float32),
    }


def _layer_norm(h, g, b):
    mu = jnp.mean(h, axis=-1, keepdims=True)
    var = jnp.mean((h - mu) ** 2, axis=-1, keepdims=True)
    return (h - mu) * jax.lax.rsqrt(var + LN_EPS) * g + b


def _reference_forward(feat_in, yaw_candidate, params):
    B, _, C = feat_in.shape
    _, n, _ = yaw_candidate.shape
    x = jnp.concatenate([jnp.tile(feat_in, (1, n, 1)), yaw_candidate], axis=2)

    def head(br):
        h = x @ params["W1"][br] + params["b1"][br]
        h = jax.nn.relu(_layer_norm(h, params["g1"][br], params["be1"][br]))
        h2 = h @ params["W2"][br] + params["b2"][br]
        h2 = _layer_norm(h2, params["g2"][br], params["be2"][br])
        sc = x @ params["Ws"][br] + params["bs"][br]
        sc = _layer_norm(sc, params["gs"][br], params["bes"][br])
        m = jax.nn.relu(h2 + sc)
        return m @ params["Wf"][br] + params["bf"][br]

    prob = jax.nn.softmax(head(0)[..., 0], axis=-1)
    mean = head(1)
    return prob, mean


if __name__ == "__main__":
    B, n, C, H = 2, 8, 32, 64

    key = jax.random.PRNGKey(0)
    k_feat, k_cand, k_par = jax.random.split(key, 3)
    feat_in = jax.random.normal(k_feat, (B, 1, C), jnp.float32)        # [B, 1, in_channels]
    yaw_candidate = jax.random.normal(k_cand, (B, n, 1), jnp.float32)  # [B, n, 1]
    params = init_params(k_par, C, H)

    prob, mean = yaw_vel_pred_forward(feat_in, yaw_candidate, params)
    prob, mean = jax.block_until_ready((prob, mean))

    prob_ref, mean_ref = _reference_forward(feat_in, yaw_candidate, params)
    assert prob.shape == (B, n) and mean.shape == (B, n, 1)
    assert jnp.allclose(prob, prob_ref, atol=1e-4, rtol=1e-4)
    assert jnp.allclose(mean, mean_ref, atol=1e-4, rtol=1e-4)
    assert jnp.allclose(jnp.sum(prob, axis=-1), jnp.ones((B,)), atol=1e-5)

    print("KERNEL_OK")
</pallas_src>

<mosaic_0001>
module attributes {stable_mosaic.version = 11 : i64} {
  func.func @_yaw_vel_kernel(%arg0: i32, %arg1: memref<8x32xf32, #tpu.memory_space<vmem>>, %arg2: memref<64x1xf32, #tpu.memory_space<vmem>>, %arg3: memref<64x8xf32, #tpu.memory_space<vmem>>, %arg4: memref<32x512xf32, #tpu.memory_space<vmem>>, %arg5: memref<1x512xf32, #tpu.memory_space<vmem>>, %arg6: memref<1x512xf32, #tpu.memory_space<vmem>>, %arg7: memref<1x256xf32, #tpu.memory_space<vmem>>, %arg8: memref<1x256xf32, #tpu.memory_space<vmem>>, %arg9: memref<128x256xf32, #tpu.memory_space<vmem>>, %arg10: memref<1x256xf32, #tpu.memory_space<vmem>>, %arg11: memref<1x128xf32, #tpu.memory_space<vmem>>, %arg12: memref<1x128xf32, #tpu.memory_space<vmem>>, %arg13: memref<128x128xf32, #tpu.memory_space<vmem>>, %arg14: memref<1x128xf32, #tpu.memory_space<vmem>>, %arg15: memref<256x256xf32, #tpu.memory_space<vmem>>, %arg16: memref<128x128xf32, #tpu.memory_space<vmem>>, %arg17: memref<64x128xf32, #tpu.memory_space<vmem>>) attributes {dimension_semantics = [#tpu.dimension_semantics<parallel>], iteration_bounds = array<i64: 2>, scalar_prefetch = 0 : i64, scratch_operands = 0 : i64, tpu.core_type = #tpu.core_type<tc>, window_params = [{transform_indices = @transform_0, window_bounds = array<i64: 8, 32>}, {transform_indices = @transform_1, window_bounds = array<i64: 64, 1>}, {pipeline_mode = #tpu.pipeline_mode<synchronous>, transform_indices = @transform_2, window_bounds = array<i64: 64, 8>}, {pipeline_mode = #tpu.pipeline_mode<synchronous>, transform_indices = @transform_3, window_bounds = array<i64: 32, 512>}, {pipeline_mode = #tpu.pipeline_mode<synchronous>, transform_indices = @transform_4, window_bounds = array<i64: 1, 512>}, {pipeline_mode = #tpu.pipeline_mode<synchronous>, transform_indices = @transform_5, window_bounds = array<i64: 1, 512>}, {pipeline_mode = #tpu.pipeline_mode<synchronous>, transform_indices = @transform_6, window_bounds = array<i64: 1, 256>}, {pipeline_mode = #tpu.pipeline_mode<synchronous>, transform_indices = @transform_7, window_bounds = array<i64: 1, 256>}, {pipeline_mode = #tpu.pipeline_mode<synchronous>, transform_indices = @transform_8, window_bounds = array<i64: 128, 256>}, {pipeline_mode = #tpu.pipeline_mode<synchronous>, transform_indices = @transform_9, window_bounds = array<i64: 1, 256>}, {pipeline_mode = #tpu.pipeline_mode<synchronous>, transform_indices = @transform_10, window_bounds = array<i64: 1, 128>}, {pipeline_mode = #tpu.pipeline_mode<synchronous>, transform_indices = @transform_11, window_bounds = array<i64: 1, 128>}, {pipeline_mode = #tpu.pipeline_mode<synchronous>, transform_indices = @transform_12, window_bounds = array<i64: 128, 128>}, {pipeline_mode = #tpu.pipeline_mode<synchronous>, transform_indices = @transform_13, window_bounds = array<i64: 1, 128>}, {pipeline_mode = #tpu.pipeline_mode<synchronous>, transform_indices = @transform_14, window_bounds = array<i64: 256, 256>}, {pipeline_mode = #tpu.pipeline_mode<synchronous>, transform_indices = @transform_15, window_bounds = array<i64: 128, 128>}, {transform_indices = @transform_16, window_bounds = array<i64: 64, 128>}]} {
    %c0 = arith.constant 0 : index
    %c0_0 = arith.constant 0 : index
    %0 = vector.load %arg1[%c0, %c0_0] : memref<8x32xf32, #tpu.memory_space<vmem>>, vector<8x32xf32>
    %c0_1 = arith.constant 0 : index
    %c0_2 = arith.constant 0 : index
    %1 = vector.load %arg2[%c0_1, %c0_2] : memref<64x1xf32, #tpu.memory_space<vmem>>, vector<64x1xf32>
    %c0_3 = arith.constant 0 : index
    %c0_4 = arith.constant 0 : index
    %2 = vector.load %arg4[%c0_3, %c0_4] : memref<32x512xf32, #tpu.memory_space<vmem>>, vector<32x512xf32>
    %cst = arith.constant dense<0.000000e+00> : vector<8x512xf32>
    %3 = tpu.matmul %0, %2, %cst {dimension_numbers = #tpu.dot_dimension_numbers<[1], [0], [0], [1], [0, 0, 1, 1], [], []>} : vector<8x32xf32>, vector<32x512xf32>, vector<8x512xf32> -> vector<8x512xf32>
    %c0_5 = arith.constant 0 : index
    %c0_6 = arith.constant 0 : index
    %4 = vector.load %arg3[%c0_5, %c0_6] : memref<64x8xf32, #tpu.memory_space<vmem>>, vector<64x8xf32>
    %cst_7 = arith.constant dense<0.000000e+00> : vector<64x512xf32>
    %5 = tpu.matmul %4, %3, %cst_7 {dimension_numbers = #tpu.dot_dimension_numbers<[1], [0], [0], [1], [0, 0, 1, 1], [], []>} : vector<64x8xf32>, vector<8x512xf32>, vector<64x512xf32> -> vector<64x512xf32>
    %c0_8 = arith.constant 0 : index
    %c0_9 = arith.constant 0 : index
    %6 = vector.load %arg5[%c0_8, %c0_9] : memref<1x512xf32, #tpu.memory_space<vmem>>, vector<1x512xf32>
    %7 = vector.broadcast %1 : vector<64x1xf32> to vector<64x512xf32>
    %8 = vector.broadcast %6 : vector<1x512xf32> to vector<64x512xf32>
    %9 = arith.mulf %7, %8 : vector<64x512xf32>
    %10 = arith.addf %5, %9 : vector<64x512xf32>
    %c0_10 = arith.constant 0 : index
    %c0_11 = arith.constant 0 : index
    %11 = vector.load %arg6[%c0_10, %c0_11] : memref<1x512xf32, #tpu.memory_space<vmem>>, vector<1x512xf32>
    %12 = vector.broadcast %11 : vector<1x512xf32> to vector<64x512xf32>
    %13 = arith.addf %10, %12 : vector<64x512xf32>
    %14 = vector.extract_strided_slice %13 {offsets = [0, 0], sizes = [64, 256], strides = [1, 1]} : vector<64x512xf32> to vector<64x256xf32>
    %15 = vector.extract_strided_slice %13 {offsets = [0, 256], sizes = [64, 256], strides = [1, 1]} : vector<64x512xf32> to vector<64x256xf32>
    %16 = arith.subf %14, %15 : vector<64x256xf32>
    %17 = arith.mulf %16, %16 : vector<64x256xf32>
    %c0_12 = arith.constant 0 : index
    %c0_13 = arith.constant 0 : index
    %18 = vector.load %arg15[%c0_12, %c0_13] : memref<256x256xf32, #tpu.memory_space<vmem>>, vector<256x256xf32>
    %cst_14 = arith.constant dense<0.000000e+00> : vector<64x256xf32>
    %19 = tpu.matmul %17, %18, %cst_14 {dimension_numbers = #tpu.dot_dimension_numbers<[1], [0], [0], [1], [0, 0, 1, 1], [], []>} : vector<64x256xf32>, vector<256x256xf32>, vector<64x256xf32> -> vector<64x256xf32>
    %cst_15 = arith.constant 9.99999974E-6 : f32
    %20 = vector.broadcast %cst_15 : f32 to vector<64x256xf32>
    %21 = arith.addf %19, %20 : vector<64x256xf32>
    %22 = math.rsqrt %21 : vector<64x256xf32>
    %23 = arith.mulf %16, %22 : vector<64x256xf32>
    %c0_16 = arith.constant 0 : index
    %c0_17 = arith.constant 0 : index
    %24 = vector.load %arg7[%c0_16, %c0_17] : memref<1x256xf32, #tpu.memory_space<vmem>>, vector<1x256xf32>
    %25 = vector.broadcast %24 : vector<1x256xf32> to vector<64x256xf32>
    %26 = arith.mulf %23, %25 : vector<64x256xf32>
    %c0_18 = arith.constant 0 : index
    %c0_19 = arith.constant 0 : index
    %27 = vector.load %arg8[%c0_18, %c0_19] : memref<1x256xf32, #tpu.memory_space<vmem>>, vector<1x256xf32>
    %28 = vector.broadcast %27 : vector<1x256xf32> to vector<64x256xf32>
    %29 = arith.addf %26, %28 : vector<64x256xf32>
    %30 = vector.extract_strided_slice %29 {offsets = [0, 0], sizes = [64, 128], strides = [1, 1]} : vector<64x256xf32> to vector<64x128xf32>
    %cst_20 = arith.constant 0.000000e+00 : f32
    %31 = vector.broadcast %cst_20 : f32 to vector<64x128xf32>
    %32 = arith.maximumf %30, %31 : vector<64x128xf32>
    %33 = vector.extract_strided_slice %29 {offsets = [0, 128], sizes = [64, 128], strides = [1, 1]} : vector<64x256xf32> to vector<64x128xf32>
    %c0_21 = arith.constant 0 : index
    %c0_22 = arith.constant 0 : index
    %34 = vector.load %arg9[%c0_21, %c0_22] : memref<128x256xf32, #tpu.memory_space<vmem>>, vector<128x256xf32>
    %cst_23 = arith.constant dense<0.000000e+00> : vector<64x256xf32>
    %35 = tpu.matmul %32, %34, %cst_23 {dimension_numbers = #tpu.dot_dimension_numbers<[1], [0], [0], [1], [0, 0, 1, 1], [], []>} : vector<64x128xf32>, vector<128x256xf32>, vector<64x256xf32> -> vector<64x256xf32>
    %c0_24 = arith.constant 0 : index
    %c0_25 = arith.constant 0 : index
    %36 = vector.load %arg10[%c0_24, %c0_25] : memref<1x256xf32, #tpu.memory_space<vmem>>, vector<1x256xf32>
    %37 = vector.broadcast %36 : vector<1x256xf32> to vector<64x256xf32>
    %38 = arith.addf %35, %37 : vector<64x256xf32>
    %39 = vector.extract_strided_slice %38 {offsets = [0, 0], sizes = [64, 128], strides = [1, 1]} : vector<64x256xf32> to vector<64x128xf32>
    %40 = vector.extract_strided_slice %38 {offsets = [0, 128], sizes = [64, 128], strides = [1, 1]} : vector<64x256xf32> to vector<64x128xf32>
    %41 = arith.subf %39, %40 : vector<64x128xf32>
    %42 = arith.mulf %41, %41 : vector<64x128xf32>
    %c0_26 = arith.constant 0 : index
    %c0_27 = arith.constant 0 : index
    %43 = vector.load %arg16[%c0_26, %c0_27] : memref<128x128xf32, #tpu.memory_space<vmem>>, vector<128x128xf32>
    %cst_28 = arith.constant dense<0.000000e+00> : vector<64x128xf32>
    %44 = tpu.matmul %42, %43, %cst_28 {dimension_numbers = #tpu.dot_dimension_numbers<[1], [0], [0], [1], [0, 0, 1, 1], [], []>} : vector<64x128xf32>, vector<128x128xf32>, vector<64x128xf32> -> vector<64x128xf32>
    %cst_29 = arith.constant 9.99999974E-6 : f32
    %45 = vector.broadcast %cst_29 : f32 to vector<64x128xf32>
    %46 = arith.addf %44, %45 : vector<64x128xf32>
    %47 = math.rsqrt %46 : vector<64x128xf32>
    %48 = arith.mulf %41, %47 : vector<64x128xf32>
    %c0_30 = arith.constant 0 : index
    %c0_31 = arith.constant 0 : index
    %49 = vector.load %arg11[%c0_30, %c0_31] : memref<1x128xf32, #tpu.memory_space<vmem>>, vector<1x128xf32>
    %50 = vector.broadcast %49 : vector<1x128xf32> to vector<64x128xf32>
    %51 = arith.mulf %48, %50 : vector<64x128xf32>
    %c0_32 = arith.constant 0 : index
    %c0_33 = arith.constant 0 : index
    %52 = vector.load %arg12[%c0_32, %c0_33] : memref<1x128xf32, #tpu.memory_space<vmem>>, vector<1x128xf32>
    %53 = vector.broadcast %52 : vector<1x128xf32> to vector<64x128xf32>
    %54 = arith.addf %51, %53 : vector<64x128xf32>
    %55 = arith.addf %54, %33 : vector<64x128xf32>
    %cst_34 = arith.constant 0.000000e+00 : f32
    %56 = vector.broadcast %cst_34 : f32 to vector<64x128xf32>
    %57 = arith.maximumf %55, %56 : vector<64x128xf32>
    %c0_35 = arith.constant 0 : index
    %c0_36 = arith.constant 0 : index
    %58 = vector.load %arg13[%c0_35, %c0_36] : memref<128x128xf32, #tpu.memory_space<vmem>>, vector<128x128xf32>
    %cst_37 = arith.constant dense<0.000000e+00> : vector<64x128xf32>
    %59 = tpu.matmul %57, %58, %cst_37 {dimension_numbers = #tpu.dot_dimension_numbers<[1], [0], [0], [1], [0, 0, 1, 1], [], []>} : vector<64x128xf32>, vector<128x128xf32>, vector<64x128xf32> -> vector<64x128xf32>
    %c0_38 = arith.constant 0 : index
    %c0_39 = arith.constant 0 : index
    %60 = vector.load %arg14[%c0_38, %c0_39] : memref<1x128xf32, #tpu.memory_space<vmem>>, vector<1x128xf32>
    %61 = vector.broadcast %60 : vector<1x128xf32> to vector<64x128xf32>
    %62 = arith.addf %59, %61 : vector<64x128xf32>
    %c0_40 = arith.constant 0 : index
    %c0_41 = arith.constant 0 : index
    %63 = vector.load %arg17[%c0_40, %c0_41] : memref<64x128xf32, #tpu.memory_space<vmem>>, vector<64x128xf32>
    tpu.vector_store %arg17[%c0_40, %c0_41], %62 {strides = array<i32>} : memref<64x128xf32, #tpu.memory_space<vmem>>, vector<64x128xf32>,
    return
  }
  func.func @transform_0(%arg0: i32) -> (i32, i32) {
    %c0_i32 = arith.constant 0 : i32
    %c0_i32_0 = arith.constant 0 : i32
    return %arg0, %c0_i32 : i32, i32
  }
  func.func @transform_1(%arg0: i32) -> (i32, i32) {
    %c0_i32 = arith.constant 0 : i32
    %c0_i32_0 = arith.constant 0 : i32
    return %arg0, %c0_i32 : i32, i32
  }
  func.func @transform_2(%arg0: i32) -> (i32, i32) {
    %c0_i32 = arith.constant 0 : i32
    %c0_i32_0 = arith.constant 0 : i32
    %c0_i32_1 = arith.constant 0 : i32
    return %c0_i32, %c0_i32_0 : i32, i32
  }
  func.func @transform_3(%arg0: i32) -> (i32, i32) {
    %c0_i32 = arith.constant 0 : i32
    %c0_i32_0 = arith.constant 0 : i32
    %c0_i32_1 = arith.constant 0 : i32
    return %c0_i32, %c0_i32_0 : i32, i32
  }
  func.func @transform_4(%arg0: i32) -> (i32, i32) {
    %c0_i32 = arith.constant 0 : i32
    %c0_i32_0 = arith.constant 0 : i32
    %c0_i32_1 = arith.constant 0 : i32
    return %c0_i32, %c0_i32_0 : i32, i32
  }
  func.func @transform_5(%arg0: i32) -> (i32, i32) {
    %c0_i32 = arith.constant 0 : i32
    %c0_i32_0 = arith.constant 0 : i32
    %c0_i32_1 = arith.constant 0 : i32
    return %c0_i32, %c0_i32_0 : i32, i32
  }
  func.func @transform_6(%arg0: i32) -> (i32, i32) {
    %c0_i32 = arith.constant 0 : i32
    %c0_i32_0 = arith.constant 0 : i32
    %c0_i32_1 = arith.constant 0 : i32
    return %c0_i32, %c0_i32_0 : i32, i32
  }
  func.func @transform_7(%arg0: i32) -> (i32, i32) {
    %c0_i32 = arith.constant 0 : i32
    %c0_i32_0 = arith.constant 0 : i32
    %c0_i32_1 = arith.constant 0 : i32
    return %c0_i32, %c0_i32_0 : i32, i32
  }
  func.func @transform_8(%arg0: i32) -> (i32, i32) {
    %c0_i32 = arith.constant 0 : i32
    %c0_i32_0 = arith.constant 0 : i32
    %c0_i32_1 = arith.constant 0 : i32
    return %c0_i32, %c0_i32_0 : i32, i32
  }
  func.func @transform_9(%arg0: i32) -> (i32, i32) {
    %c0_i32 = arith.constant 0 : i32
    %c0_i32_0 = arith.constant 0 : i32
    %c0_i32_1 = arith.constant 0 : i32
    return %c0_i32, %c0_i32_0 : i32, i32
  }
  func.func @transform_10(%arg0: i32) -> (i32, i32) {
    %c0_i32 = arith.constant 0 : i32
    %c0_i32_0 = arith.constant 0 : i32
    %c0_i32_1 = arith.constant 0 : i32
    return %c0_i32, %c0_i32_0 : i32, i32
  }
  func.func @transform_11(%arg0: i32) -> (i32, i32) {
    %c0_i32 = arith.constant 0 : i32
    %c0_i32_0 = arith.constant 0 : i32
    %c0_i32_1 = arith.constant 0 : i32
    return %c0_i32, %c0_i32_0 : i32, i32
  }
  func.func @transform_12(%arg0: i32) -> (i32, i32) {
    %c0_i32 = arith.constant 0 : i32
    %c0_i32_0 = arith.constant 0 : i32
    %c0_i32_1 = arith.constant 0 : i32
    return %c0_i32, %c0_i32_0 : i32, i32
  }
  func.func @transform_13(%arg0: i32) -> (i32, i32) {
    %c0_i32 = arith.constant 0 : i32
    %c0_i32_0 = arith.constant 0 : i32
    %c0_i32_1 = arith.constant 0 : i32
    return %c0_i32, %c0_i32_0 : i32, i32
  }
  func.func @transform_14(%arg0: i32) -> (i32, i32) {
    %c0_i32 = arith.constant 0 : i32
    %c0_i32_0 = arith.constant 0 : i32
    %c0_i32_1 = arith.constant 0 : i32
    return %c0_i32, %c0_i32_0 : i32, i32
  }
  func.func @transform_15(%arg0: i32) -> (i32, i32) {
    %c0_i32 = arith.constant 0 : i32
    %c0_i32_0 = arith.constant 0 : i32
    %c0_i32_1 = arith.constant 0 : i32
    return %c0_i32, %c0_i32_0 : i32, i32
  }
  func.func @transform_16(%arg0: i32) -> (i32, i32) {
    %c0_i32 = arith.constant 0 : i32
    %c0_i32_0 = arith.constant 0 : i32
    return %arg0, %c0_i32 : i32, i32
  }
}

</mosaic_0001>

<bundles_post_ra>
// kernel: tpu_custom_call.1
= control target key start
LH: loop header
LB: loop body
LE: loop exit
PB: predicated region body
PF: predicated region fallthrough
CT: control target
= control target key end

     0   :  { %s4193_s0 = inlined_call_operand.hbm [shape: f32[16,32], index: 0, kind: input, shape index: {}]   ;;  %s4194_s1 = inlined_call_operand.vmem [shape: f32[128,1], index: 1, kind: input, shape index: {}]   ;;  %s4195_s2 = inlined_call_operand.vmem [shape: f32[64,8], index: 2, kind: input, shape index: {}]   ;;  %s4196_s3 = inlined_call_operand.vmem [shape: f32[32,512], index: 3, kind: input, shape index: {}]   ;;  %s4197_s4 = inlined_call_operand.hbm [shape: f32[1,512], index: 4, kind: input, shape index: {}]   ;;  %s4198_s5 = inlined_call_operand.hbm [shape: f32[1,512], index: 5, kind: input, shape index: {}]   ;;  %s4199_s6 = inlined_call_operand.hbm [shape: f32[1,256], index: 6, kind: input, shape index: {}]   ;;  %s4200_s7 = inlined_call_operand.hbm [shape: f32[1,256], index: 7, kind: input, shape index: {}]   ;;  %s4201_s8 = inlined_call_operand.hbm [shape: f32[128,256], index: 8, kind: input, shape index: {}]   ;;  %s4202_s9 = inlined_call_operand.hbm [shape: f32[1,256], index: 9, kind: input, shape index: {}]   ;;  %s4203_s10 = inlined_call_operand.vmem [shape: f32[1,128], index: 10, kind: input, shape index: {}]   ;;  %s4204_s11 = inlined_call_operand.hbm [shape: f32[1,128], index: 11, kind: input, shape index: {}]   ;;  %s4205_s12 = inlined_call_operand.hbm [shape: f32[128,128], index: 12, kind: input, shape index: {}]   ;;  %s4206_s13 = inlined_call_operand.hbm [shape: f32[1,128], index: 13, kind: input, shape index: {}]   ;;  %s4207_s14 = inlined_call_operand.hbm [shape: f32[256,256], index: 14, kind: input, shape index: {}]   ;;  %s4208_s15 = inlined_call_operand.vmem [shape: f32[128,128], index: 15, kind: input, shape index: {}]   ;;  %s4209_s16 = inlined_call_operand.hbm [shape: f32[128,128], index: 16, kind: output, shape index: {}]  }
   0x1   :  { %4219 = sst [smem:[#allocation29_spill]] %s4193_s0 }
   0x2   :  { %4220 = sst [smem:[#allocation30_spill]] %s4194_s1 }
   0x3   :  { %4221 = sst [smem:[#allocation31_spill]] %s4195_s2 }
   0x4   :  { %4222 = sst [smem:[#allocation32_spill]] %s4196_s3 }
   0x5   :  { %4223 = sst [smem:[#allocation33_spill]] %s4197_s4 }
   0x6   :  { %4224 = sst [smem:[#allocation34_spill]] %s4198_s5 }
   0x7   :  { %4225 = sst [smem:[#allocation35_spill]] %s4199_s6 }
   0x8   :  { %4226 = sst [smem:[#allocation36_spill]] %s4200_s7 }
   0x9   :  { %4227 = sst [smem:[#allocation37_spill]] %s4203_s10 }
   0xa   :  { %4228 = sst [smem:[#allocation38_spill]] %s4208_s15 }
   0xb   :  { %4229 = sst [smem:[#allocation39_spill]] %s4209_s16 }
   0xc   :  { %21 = vsyncpa [#allocation3], 0 }
   0xd   :  { %23 = vsyncpa [#allocation3 + $0x1], 0 }
   0xe   :  { %24 = vsyncpa [#allocation6], 0 }
   0xf   :  { %25 = vsyncpa [#allocation9], 0 }
  0x10   :  { %26 = vsyncpa [#allocation12], 0 }
  0x11   :  { %27 = vsyncpa [#allocation15], 0 }
  0x12   :  { %28 = vsyncpa [#allocation18], 0 }
  0x13   :  { %29 = vsyncpa [#allocation4], 0 }
  0x14   :  { %31 = vsyncpa [#allocation4 + $0x1], 0  ;;  %s3337_s21 = smov 0   ;;  %s3339_s22 = smov 0  }
  0x15   :  { %s3341_s23 = smov 0   ;;  %s3343_s24 = smov 0  }
  0x16 LB: > { %s3232_s25 = smov [#allocation5]   ;;  %s3358_s27 = sadd.s32 4294967295, %s3230_s24   ;;  %s3230_s24 = sphi %s3343_s24, %s4269_s24   ;;  %s3226_s23 = sphi %s3341_s23, %s4268_s23   ;;  %s3222_s22 = sphi %s3339_s22, %s4267_s22   ;;  %s3218_s21 = sphi %s3337_s21, %s4266_s21  }
  0x17   : > { %s433_s26 = sshll.u32 %s3232_s25, 4  ;;  %p2261_p0 = scmp.ge.s32.totalorder %s3230_s24, 1  ;;  %s434_s26 = int_to_ptr.vmem [resolvable:$true] %s433_s26 }
  0x18   : > { %p4213_p1 = scmp.eq.s32.totalorder %s3358_s27, 0  ;;  %p414_p2 = scmp.lt.s32.totalorder %s3230_s24, 3 }
  0x19   : > { %s3233_s29 = smov [#allocation8]   ;;  %s3234_s0 = smov [#allocation11]  }
  0x1a   : > { %p3363_p3 = pnand %p2261_p0, %p414_p2  ;;  %s455_s30 = sshll.u32 %s3233_s29, 4  ;;  %s3370_s30 = int_to_ptr.vmem [resolvable:$true] %s455_s30 }
  0x1b   : > { %s476_s17 = sshll.u32 %s3234_s0, 4  ;;  %s4233_s4 = sld [smem:[#allocation33_spill]]  ;;  %s3378_s17 = int_to_ptr.vmem [resolvable:$true] %s476_s17 }
  0x1c   : > { %s4230_s28 = scalar_select %p3363_p3, 1, 0 }
  0x1d   : > { %p2673_p5 = pneg %p3363_p3 }
  0x1e   : > { %4231 = sst [smem:[#allocation28_spill]] %s4230_s28 }
  0x1f   : > { %p3374_p6 = pnand %p2673_p5, %p4213_p1 }
  0x21   : > { %s2834_s25 = scalar_lea.hbm %s4233_s4, 64  ;;  %p3388_p8 = pneg %p3374_p6 }
  0x22   : > { %p2835_p7 = scmp.ne.s32.totalorder %s4233_s4, %s2834_s25  ;;  %p2841_p11 = scmp.lt.u32.totalorder %s2834_s25, %s4233_s4 }
  0x24   : > { %p2837_p9 = pnand %p3388_p8, %p2835_p7 }
  0x26   : > { %p2838_p10 = pneg %p2837_p9 }
  0x28   : > { %p2843_p12 = pnand %p2841_p11, %p2838_p10 }
  0x2a   : > { %2846 = shalt.err (!%p2843_p12)
}
  0x2b   : > { %s2847_s19 = scalar_lea.vmem %s434_s26, 64  ;;  %p2855_p5 = scmp.lt.s32.totalorder %s434_s26, %s434_s26 }
  0x2c   : > { %p2848_p13 = scmp.ne.s32.totalorder %s434_s26, %s2847_s19  ;;  %p2856_p4 = scmp.lt.s32.totalorder %s2847_s19, %s2847_s19 }
  0x2e   : > { %p2850_p0 = pnand %p2848_p13, %p3388_p8  ;;  %p2857_p1 = por %p2856_p4, %p2855_p5 }
  0x30   : > { %p2851_p2 = pneg %p2850_p0 }
  0x32   : > { %p2858_p3 = pnand %p2857_p1, %p2851_p2 }
  0x34   : > { %2861 = shalt.err (!%p2858_p3)
}
  0x35   : > { %2676 = dma.hbm_to_vmem [thread:$0]  (!%p3374_p6), %s4233_s4, 64, %s434_s26, [#allocation6]  }
  0x36   : > { %s4235_s6 = sld [smem:[#allocation35_spill]] }
  0x3c   : > { %s2862_s25 = scalar_lea.hbm %s4235_s6, 32 }
  0x3d   : > { %p2863_p7 = scmp.ne.s32.totalorder %s4235_s6, %s2862_s25  ;;  %p2869_p1 = scmp.lt.u32.totalorder %s2862_s25, %s4235_s6 }
  0x3f   : > { %p2865_p9 = pnand %p2863_p7, %p3388_p8 }
  0x41   : > { %p2866_p4 = pneg %p2865_p9 }
  0x43   : > { %p2871_p3 = pnand %p2869_p1, %p2866_p4 }
  0x45   : > { %2874 = shalt.err (!%p2871_p3)
}
  0x46   : > { %s2875_s26 = scalar_lea.vmem %s3370_s30, 32  ;;  %p2883_p13 = scmp.lt.s32.totalorder %s3370_s30, %s3370_s30 }
  0x47   : > { %p2876_p10 = scmp.ne.s32.totalorder %s3370_s30, %s2875_s26  ;;  %p2884_p0 = scmp.lt.s32.totalorder %s2875_s26, %s2875_s26 }
  0x49   : > { %p2878_p11 = pnand %p2876_p10, %p3388_p8  ;;  %p2885_p2 = por %p2884_p0, %p2883_p13 }
  0x4b   : > { %p2879_p12 = pneg %p2878_p11 }
  0x4d   : > { %p2886_p5 = pnand %p2885_p2, %p2879_p12 }
  0x4f   : > { %2889 = shalt.err (!%p2886_p5)
}
  0x50   : > { %2682 = dma.hbm_to_vmem [thread:$0]  (!%p3374_p6), %s4235_s6, 32, %s3370_s30, [#allocation9]  }
  0x51   : > { %s2890_s15 = scalar_lea.hbm %s4201_s8, 4096 }
  0x52   : > { %p2891_p7 = scmp.ne.s32.totalorder %s4201_s8, %s2890_s15  ;;  %p2897_p1 = scmp.lt.u32.totalorder %s2890_s15, %s4201_s8 }
  0x54   : > { %p2893_p9 = pnand %p2891_p7, %p3388_p8 }
  0x56   : > { %p2894_p4 = pneg %p2893_p9 }
  0x58   : > { %p2899_p3 = pnand %p2897_p1, %p2894_p4 }
  0x5a   : > { %2902 = shalt.err (!%p2899_p3)
}
  0x5b   : > { %s2903_s30 = scalar_lea.vmem %s3378_s17, 4096  ;;  %p2911_p13 = scmp.lt.s32.totalorder %s3378_s17, %s3378_s17 }
  0x5c   : > { %p2904_p10 = scmp.ne.s32.totalorder %s3378_s17, %s2903_s30  ;;  %p2912_p0 = scmp.lt.s32.totalorder %s2903_s30, %s2903_s30 }
  0x5e   : > { %p2906_p11 = pnand %p2904_p10, %p3388_p8  ;;  %p2913_p2 = por %p2912_p0, %p2911_p13 }
  0x60   : > { %p2907_p12 = pneg %p2906_p11 }
  0x62   : > { %p2914_p5 = pnand %p2913_p2, %p2907_p12 }
  0x64   : > { %2917 = shalt.err (!%p2914_p5)
}
  0x65   : > { %s3235_s26 = smov 256   ;;  %s3236_s1 = smov 16  }
  0x66   : > { %2688 = dma.hbm_to_vmem [thread:$0]  (!%p3374_p6), %s4201_s8, 4096, %s3378_s17, [#allocation12], %s3235_s26, %s3235_s26, %s3236_s1  }
  0x67   : > { %s3237_s16 = smov [#allocation14]   ;;  %s3238_s20 = smov [#allocation17]  }
  0x68   : > { %s504_s15 = sshll.u32 %s3237_s16, 4  ;;  %s528_s25 = sshll.u32 %s3238_s20, 4  ;;  %s505_s15 = int_to_ptr.vmem [resolvable:$true] %s504_s15  ;;  %s529_s25 = int_to_ptr.vmem [resolvable:$true] %s528_s25 }
  0x69   : > { %s2918_s30 = scalar_lea.hbm %s4204_s11, 16 }
  0x6a   : > { %p2919_p7 = scmp.ne.s32.totalorder %s4204_s11, %s2918_s30  ;;  %p2925_p1 = scmp.lt.u32.totalorder %s2918_s30, %s4204_s11 }
  0x6c   : > { %p2921_p9 = pnand %p2919_p7, %p3388_p8 }
  0x6e   : > { %p2922_p4 = pneg %p2921_p9 }
  0x70   : > { %p2927_p3 = pnand %p2925_p1, %p2922_p4 }
  0x72   : > { %2930 = shalt.err (!%p2927_p3)
}
  0x73   : > { %s2931_s17 = scalar_lea.vmem %s505_s15, 16  ;;  %s2938_s2 = scalar_lea.vmem %s505_s15, 32 }
  0x74   : > { %p2932_p10 = scmp.ne.s32.totalorder %s505_s15, %s2931_s17  ;;  %p2939_p13 = scmp.lt.s32.totalorder %s505_s15, %s505_s15 }
  0x75   : > { %p2940_p0 = scmp.lt.s32.totalorder %s2938_s2, %s2931_s17 }
  0x76   : > { %p2934_p11 = pnand %p2932_p10, %p3388_p8 }
  0x77   : > { %p2941_p2 = por %p2940_p0, %p2939_p13 }
  0x78   : > { %p2935_p12 = pneg %p2934_p11 }
  0x7a   : > { %p2942_p5 = pnand %p2941_p2, %p2935_p12 }
  0x7c   : > { %2945 = shalt.err (!%p2942_p5)
}
  0x7d   : > { %2694 = dma.hbm_to_vmem [thread:$0]  (!%p3374_p6), %s4204_s11, 16, %s505_s15, [#allocation15]  }
  0x7e   : > { %s2946_s10 = scalar_lea.hbm %s4206_s13, 16 }
  0x7f   : > { %p2947_p7 = scmp.ne.s32.totalorder %s4206_s13, %s2946_s10  ;;  %p2953_p1 = scmp.lt.u32.totalorder %s2946_s10, %s4206_s13 }
  0x81   : > { %p2949_p9 = pnand %p2947_p7, %p3388_p8 }
  0x83   : > { %p2950_p4 = pneg %p2949_p9 }
  0x85   : > { %p2955_p3 = pnand %p2953_p1, %p2950_p4 }
  0x87   : > { %2958 = shalt.err (!%p2955_p3)
}
  0x88   : > { %s2959_s30 = scalar_lea.vmem %s529_s25, 16  ;;  %s2966_s15 = scalar_lea.vmem %s529_s25, 32 }
  0x89   : > { %p2960_p10 = scmp.ne.s32.totalorder %s529_s25, %s2959_s30  ;;  %p2967_p13 = scmp.lt.s32.totalorder %s529_s25, %s529_s25 }
  0x8a   : > { %p2968_p0 = scmp.lt.s32.totalorder %s2966_s15, %s2959_s30 }
  0x8b   : > { %p2962_p11 = pnand %p2960_p10, %p3388_p8 }
  0x8c   : > { %p2969_p2 = por %p2968_p0, %p2967_p13 }
  0x8d   : > { %p2963_p12 = pneg %p2962_p11 }
  0x8f   : > { %p2970_p5 = pnand %p2969_p2, %p2963_p12 }
  0x91   : > { %2973 = shalt.err (!%p2970_p5)
}
  0x92   : > { %2700 = dma.hbm_to_vmem [thread:$0]  (!%p3374_p6), %s4206_s13, 16, %s529_s25, [#allocation18]  }
  0x93   : > { %s3239_s4 = smov [#allocation7]   ;;  %s3240_s3 = smov [#allocation10]  }
  0x94   : > { %s444_s6 = sshll.u32 %s3239_s4, 4  ;;  %s466_s28 = sshll.u32 %s3240_s3, 4  ;;  %s445_s6 = int_to_ptr.vmem [resolvable:$true] %s444_s6  ;;  %s467_s28 = int_to_ptr.vmem [resolvable:$true] %s466_s28 }
  0x95   : > { %s4236_s5 = sld [smem:[#allocation34_spill]] }
  0x9b   : > { %s2974_s20 = scalar_lea.hbm %s4236_s5, 64 }
  0x9c   : > { %p2975_p7 = scmp.ne.s32.totalorder %s4236_s5, %s2974_s20  ;;  %p2981_p1 = scmp.lt.u32.totalorder %s2974_s20, %s4236_s5 }
  0x9e   : > { %p2977_p9 = pnand %p2975_p7, %p3388_p8 }
  0xa0   : > { %p2978_p4 = pneg %p2977_p9 }
  0xa2   : > { %p2983_p3 = pnand %p2981_p1, %p2978_p4 }
  0xa4   : > { %2986 = shalt.err (!%p2983_p3)
}
  0xa5   : > { %s2987_s25 = scalar_lea.vmem %s445_s6, 64  ;;  %p2995_p13 = scmp.lt.s32.totalorder %s445_s6, %s445_s6 }
  0xa6   : > { %p2988_p10 = scmp.ne.s32.totalorder %s445_s6, %s2987_s25  ;;  %p2996_p0 = scmp.lt.s32.totalorder %s2987_s25, %s2987_s25 }
  0xa8   : > { %p2990_p11 = pnand %p2988_p10, %p3388_p8  ;;  %p2997_p2 = por %p2996_p0, %p2995_p13 }
  0xaa   : > { %p2991_p12 = pneg %p2990_p11 }
  0xac   : > { %p2998_p5 = pnand %p2997_p2, %p2991_p12 }
  0xae   : > { %3001 = shalt.err (!%p2998_p5)
}
  0xaf   : > { %2679 = dma.hbm_to_vmem [thread:$0]  (!%p3374_p6), %s4236_s5, 64, %s445_s6, [#allocation6]  }
  0xb0   : > { %s4237_s7 = sld [smem:[#allocation36_spill]] }
  0xb6   : > { %s3002_s10 = scalar_lea.hbm %s4237_s7, 32 }
  0xb7   : > { %p3003_p7 = scmp.ne.s32.totalorder %s4237_s7, %s3002_s10  ;;  %p3009_p1 = scmp.lt.u32.totalorder %s3002_s10, %s4237_s7 }
  0xb9   : > { %p3005_p9 = pnand %p3003_p7, %p3388_p8 }
  0xbb   : > { %p3006_p4 = pneg %p3005_p9 }
  0xbd   : > { %p3011_p3 = pnand %p3009_p1, %p3006_p4 }
  0xbf   : > { %3014 = shalt.err (!%p3011_p3)
}
  0xc0   : > { %s3015_s30 = scalar_lea.vmem %s467_s28, 32  ;;  %p3023_p13 = scmp.lt.s32.totalorder %s467_s28, %s467_s28 }
  0xc1   : > { %p3016_p10 = scmp.ne.s32.totalorder %s467_s28, %s3015_s30  ;;  %p3024_p0 = scmp.lt.s32.totalorder %s3015_s30, %s3015_s30 }
  0xc3   : > { %p3018_p11 = pnand %p3016_p10, %p3388_p8  ;;  %p3025_p2 = por %p3024_p0, %p3023_p13 }
  0xc5   : > { %p3019_p12 = pneg %p3018_p11 }
  0xc7   : > { %p3026_p5 = pnand %p3025_p2, %p3019_p12 }
  0xc9   : > { %3029 = shalt.err (!%p3026_p5)
}
  0xca   : > { %2685 = dma.hbm_to_vmem [thread:$0]  (!%p3374_p6), %s4237_s7, 32, %s467_s28, [#allocation9]  }
  0xcb   : > { %s3241_s25 = smov [#allocation13]   ;;  %s3242_s2 = smov [#allocation16]  }
  0xcc   : > { %s490_s17 = sshll.u32 %s3241_s25, 4  ;;  %s514_s4 = sshll.u32 %s3242_s2, 4  ;;  %s491_s17 = int_to_ptr.vmem [resolvable:$true] %s490_s17  ;;  %s515_s4 = int_to_ptr.vmem [resolvable:$true] %s514_s4 }
  0xcd   : > { %s3030_s16 = scalar_lea.hbm %s4202_s9, 32 }
  0xce   : > { %p3031_p7 = scmp.ne.s32.totalorder %s4202_s9, %s3030_s16  ;;  %p3037_p1 = scmp.lt.u32.totalorder %s3030_s16, %s4202_s9 }
  0xd0   : > { %p3033_p9 = pnand %p3031_p7, %p3388_p8 }
  0xd2   : > { %p3034_p4 = pneg %p3033_p9 }
  0xd4   : > { %p3039_p3 = pnand %p3037_p1, %p3034_p4 }
  0xd6   : > { %3042 = shalt.err (!%p3039_p3)
}
  0xd7   : > { %s3043_s28 = scalar_lea.vmem %s491_s17, 32  ;;  %p3051_p13 = scmp.lt.s32.totalorder %s491_s17, %s491_s17 }
  0xd8   : > { %p3044_p10 = scmp.ne.s32.totalorder %s491_s17, %s3043_s28  ;;  %p3052_p0 = scmp.lt.s32.totalorder %s3043_s28, %s3043_s28 }
  0xda   : > { %p3046_p11 = pnand %p3044_p10, %p3388_p8  ;;  %p3053_p2 = por %p3052_p0, %p3051_p13 }
  0xdc   : > { %p3047_p12 = pneg %p3046_p11 }
  0xde   : > { %p3054_p5 = pnand %p3053_p2, %p3047_p12 }
  0xe0   : > { %3057 = shalt.err (!%p3054_p5)
}
  0xe1   : > { %2691 = dma.hbm_to_vmem [thread:$0]  (!%p3374_p6), %s4202_s9, 32, %s491_s17, [#allocation12]  }
  0xe2   : > { %s3058_s3 = scalar_lea.hbm %s4205_s12, 2048 }
  0xe3   : > { %p3059_p7 = scmp.ne.s32.totalorder %s4205_s12, %s3058_s3  ;;  %p3065_p1 = scmp.lt.u32.totalorder %s3058_s3, %s4205_s12 }
  0xe5   : > { %p3061_p9 = pnand %p3059_p7, %p3388_p8 }
  0xe7   : > { %p3062_p4 = pneg %p3061_p9 }
  0xe9   : > { %p3067_p3 = pnand %p3065_p1, %p3062_p4 }
  0xeb   : > { %3070 = shalt.err (!%p3067_p3)
}
  0xec   : > { %s3071_s19 = scalar_lea.vmem %s515_s4, 2048  ;;  %p3079_p13 = scmp.lt.s32.totalorder %s515_s4, %s515_s4 }
  0xed   : > { %p3072_p10 = scmp.ne.s32.totalorder %s515_s4, %s3071_s19  ;;  %p3080_p0 = scmp.lt.s32.totalorder %s3071_s19, %s3071_s19 }
  0xef   : > { %p3074_p11 = pnand %p3072_p10, %p3388_p8  ;;  %p3081_p2 = por %p3080_p0, %p3079_p13 }
  0xf1   : > { %p3075_p12 = pneg %p3074_p11 }
  0xf3   : > { %p3082_p5 = pnand %p3081_p2, %p3075_p12 }
  0xf5   : > { %3085 = shalt.err (!%p3082_p5)
}
  0xf6   : > { %s3243_s17 = smov 128   ;;  %s3244_s30 = smov 8  }
  0xf7   : > { %2697 = dma.hbm_to_vmem [thread:$0]  (!%p3374_p6), %s4205_s12, 2048, %s515_s4, [#allocation15], %s3243_s17, %s3243_s17, %s3244_s30  }
  0xf8   : > { %s3245_s15 = smov [#allocation19]   ;;  %s3086_s10 = scalar_lea.hbm %s4207_s14, 8192 }
  0xf9   : > { %s538_s25 = sshll.u32 %s3245_s15, 4  ;;  %p3087_p7 = scmp.ne.s32.totalorder %s4207_s14, %s3086_s10  ;;  %s539_s25 = int_to_ptr.vmem [resolvable:$true] %s538_s25 }
  0xfa   : > { %p3093_p1 = scmp.lt.u32.totalorder %s3086_s10, %s4207_s14 }
  0xfb   : > { %p3089_p9 = pnand %p3087_p7, %p3388_p8 }
  0xfd   : > { %p3090_p4 = pneg %p3089_p9 }
  0xff   : > { %p3095_p3 = pnand %p3093_p1, %p3090_p4 }
 0x101   : > { %3098 = shalt.err (!%p3095_p3)
}
 0x102   : > { %s3099_s4 = scalar_lea.vmem %s539_s25, 8192  ;;  %p3107_p13 = scmp.lt.s32.totalorder %s539_s25, %s539_s25 }
 0x103   : > { %p3100_p10 = scmp.ne.s32.totalorder %s539_s25, %s3099_s4  ;;  %p3108_p0 = scmp.lt.s32.totalorder %s3099_s4, %s3099_s4 }
 0x105   : > { %p3102_p11 = pnand %p3100_p10, %p3388_p8  ;;  %p3109_p2 = por %p3108_p0, %p3107_p13 }
 0x107   : > { %p3103_p12 = pneg %p3102_p11 }
 0x109   : > { %p3110_p5 = pnand %p3109_p2, %p3103_p12 }
 0x10b   : > { %3113 = shalt.err (!%p3110_p5)
}
 0x10c   : > { %2703 = dma.hbm_to_vmem [thread:$0]  (!%p3374_p6), %s4207_s14, 8192, %s539_s25, [#allocation18], %s3235_s26, %s3235_s26, %s3236_s1  }
 0x10d   : > { %s2260_s18 = sadd.s32 4294967294, %s3230_s24   ;;  %s3584_s29 = sadd.s32 1, %s3230_s24  }
 0x10e   : > { %s41_s28 = ssub.s32 %s3230_s24, %s3584_s29  ;;  %s44_s6 = sadd.s32 1, %s3226_s23 }
 0x10f   : > { %p42_p8 = scmp.eq.s32.totalorder %s41_s28, 0  ;;  %p51_p7 = scmp.ne.s32.totalorder %s3226_s23, %s3222_s22 }
 0x110   : > { %p52_p9 = scmp.eq.s32.totalorder %s3230_s24, 0  ;;  %p57_p4 = scmp.ne.s32.totalorder %s3222_s22, %s3218_s21 }
 0x111   : > { %s3595_s15 = scalar_select %p42_p8, %s3226_s23, %s44_s6  }
 0x112   : > { %p3597_p1 = por %p52_p9, %p51_p7  ;;  %p4239_p3 = scmp.eq.s32.totalorder %s3358_s27, 0 }
 0x113   : > { %p401_p10 = scmp.eq.s32.totalorder %s3358_s27, 1  ;;  %p407_p11 = scmp.eq.s32.totalorder %s2260_s18, 1 }
 0x114   : > { %p3603_p6 = por %p4239_p3, %p57_p4  ;;  %p2722_p12 = scmp.lt.s32.totalorder %s3230_s24, 2 }
 0x115   : > { %s555_s1 = sand.u32 1, %s3226_s23   ;;  %p3610_p13 = por %p401_p10, %p51_p7 }
 0x116   : > { %p3614_p0 = por %p407_p11, %p57_p4  ;;  %s2273_s10 = sshll.u32 %s555_s1, 3 }
 0x117   : > { %s4241_s25 = scalar_select %p3610_p13, 1, 0 }
 0x118   : > { %s4242_s3 = scalar_select %p3614_p0, 1, 0 }
 0x119   : > { %s2274_s16 = sshll.u32 %s3230_s24, 7  ;;  %s4243_s19 = sld [smem:[#allocation29_spill]] }
 0x11a   : > { %s559_s17 = scalar_lea.vmem [#allocation2], %s2273_s10  ;;  %p3628_p2 = pnand %p2722_p12, %p3597_p1 }
 0x11b   : > { %s566_s30 = sshll.u32 %s559_s17, 4  ;;  %s556_s28 = scalar_lea.sflag [#allocation3], %s555_s1  ;;  %s3624_s30 = int_to_ptr.vmem [resolvable:$true] %s566_s30 }
 0x11c   : > { %p3116_p8 = pneg %p3628_p2 }
 0x11f   : > { %s3622_s4 = scalar_lea.hbm %s4243_s19, %s2274_s16  ;;  %s3119_s20 = scalar_lea.hbm %s4243_s19, 256 }
 0x120   : > { %s3114_s6 = scalar_lea.hbm %s3622_s4, 128  ;;  %p3120_p4 = scmp.lt.u32.totalorder %s3622_s4, %s4243_s19 }
 0x121   : > { %p3115_p5 = scmp.ne.s32.totalorder %s3622_s4, %s3114_s6  ;;  %p3121_p1 = scmp.lt.u32.totalorder %s3119_s20, %s3114_s6 }
 0x122   : > { %p3123_p10 = scmp.lt.u32.totalorder %s3114_s6, %s3622_s4 }
 0x123   : > { %p3117_p7 = pnand %p3116_p8, %p3115_p5  ;;  %p3122_p3 = por %p3121_p1, %p3120_p4 }
 0x125   : > { %p3118_p9 = pneg %p3117_p7  ;;  %p3124_p11 = por %p3123_p10, %p3122_p3 }
 0x127   : > { %p3125_p12 = pnand %p3124_p11, %p3118_p9 }
 0x129   : > { %3128 = shalt.err (!%p3125_p12)
}
 0x12a   : > { %s3129_s1 = scalar_lea.vmem %s3624_s30, 128  ;;  %s3246_s17 = smov [#allocation2]  }
 0x12b   : > { %p3130_p5 = scmp.ne.s32.totalorder %s3624_s30, %s3129_s1  ;;  %s3134_s10 = sshll.u32 %s3246_s17, 4  ;;  %s3135_s10 = int_to_ptr.vmem [resolvable:$false] %s3134_s10 }
 0x12c   : > { %s3136_s16 = scalar_lea.vmem %s3135_s10, 256  ;;  %p3137_p13 = scmp.lt.s32.totalorder %s3624_s30, %s3135_s10 }
 0x12d   : > { %p3132_p7 = pnand %p3130_p5, %p3116_p8  ;;  %p3138_p4 = scmp.lt.s32.totalorder %s3136_s16, %s3129_s1 }
 0x12f   : > { %p3133_p0 = pneg %p3132_p7  ;;  %p3139_p1 = por %p3138_p4, %p3137_p13 }
 0x131   : > { %p3140_p3 = pnand %p3139_p1, %p3133_p0 }
 0x133   : > { %3143 = shalt.err (!%p3140_p3)
}
 0x134   : > { %2707 = dma.hbm_to_vmem [thread:$0]  (!%p3628_p2), %s3622_s4, 128, %s3624_s30, %s556_s28  }
 0x135   : > { %s4245_s6 = sld [smem:[#allocation28_spill]] }
 0x13b   : > { %p4246_p9 = scmp.ne.s32.totalorder %s4245_s6, 0 }
 0x13c   : > { %s3660_s20 = sand.u32 (!%p4246_p9), 1, %s3222_s22  }
 0x13d   : > { %584 = sbr.rel (%p4246_p9) target bundleno = 1751 (0x6d7), region = 84  ;;  %s2276_s2 = sshll.u32 (!%p4246_p9), %s3660_s20, 3 }
 0x13e   : > { %s587_s0 = scalar_lea.sflag (!%p4246_p9), [#allocation3], %s3660_s20  ;;  %s3664_s1 = scalar_lea.vmem (!%p4246_p9), [#allocation2], %s2276_s2 }
 0x144   : > { %3189 = dma.done.wait (%p3603_p6), %s587_s0, 128  }
 0x145   : > { %3191 = vsyncadd (%p3603_p6), %s587_s0, 4294967168  ;;  %p4247_p13 = scmp.eq.s32.totalorder %s3358_s27, 0 }
 0x147   : > { %3193 = dma.done.wait (%p4247_p13), [#allocation6], 128   ;;  %p4248_p0 = pmov %p4247_p13 }
 0x149   : > { %3195 = vsyncadd (%p4248_p0), [#allocation6], 4294967168  ;;  %p4249_p2 = pmov %p4248_p0 }
 0x14a   : > { %p4250_p8 = pmov %p4248_p0 }
 0x14b   : > { %3197 = dma.done.wait (%p4249_p2), [#allocation9], 64  }
 0x14c   : > { %3199 = vsyncadd (%p4250_p8), [#allocation9], 4294967232  ;;  %p4251_p10 = pmov %p4248_p0 }
 0x14d   : > { %p4252_p11 = pmov %p4248_p0 }
 0x14e   : > { %3201 = dma.done.wait (%p4251_p10), [#allocation12], 4128  }
 0x14f   : > { %3203 = vsyncadd (%p4252_p11), [#allocation12], 4294963168  ;;  %p4253_p6 = pmov %p4248_p0 }
 0x150   : > { %p4254_p12 = pmov %p4248_p0 }
 0x151   : > { %3205 = dma.done.wait (%p4253_p6), [#allocation15], 2064  }
 0x152   : > { %3207 = vsyncadd (%p4254_p12), [#allocation15], 4294965232  ;;  %p4255_p5 = pmov %p4248_p0 }
 0x153   : > { %p4256_p7 = pmov %p4248_p0 }
 0x154   : > { %3209 = dma.done.wait (%p4255_p5), [#allocation18], 8208  }
 0x155   : > { %3211 = vsyncadd (%p4256_p7), [#allocation18], 4294959088  ;;  %v3247_v0 = vmov 0.0   ;;  %s4257_s30 = sld [smem:[#allocation32_spill]]  ;;  %v691_v20 = vld [vmem:[%s3664_s1] sm:$0xff]  ;;  %vm716_vm0 = vcmask 261120  }
 0x156   : > { %784 = vmatprep.mubr.f32.mxu1 %v3247_v0  ;;  %1053 = vmatprep.mubr.f32.mxu0 %v3247_v0  ;;  %s2288_s1 = sshll.u32 %s3358_s27, 3  ;;  %v3248_v26 = vmov 0   ;;  %s4258_s18 = sld [smem:[#allocation30_spill]]  ;;  %v1302_v35 = vld [vmem:[#allocation19 + $0x8] sm:$0xff]  ;;  %v1304_v36 = vld [vmem:[#allocation19 + $0x18] sm:$0xff]  ;;  %v1301_v37 = vld [vmem:[#allocation19] sm:$0xff] }
 0x157   : > { %2784 = vset.pattern.permute.xlu0 %v3248_v26  ;;  %p685_p4 = scmp.lt.s32.totalorder %s2288_s1, 15  ;;  %2785 = vset.pattern.permute.xlu1 %v3248_v26  ;;  %v1303_v38 = vld [vmem:[#allocation19 + $0x10] sm:$0xff]  ;;  %v1306_v39 = vld [vmem:[#allocation19 + $0x28] sm:$0xff]  ;;  %v1308_v40 = vld [vmem:[#allocation19 + $0x38] sm:$0xff]  ;;  %v2469_v42 = vpack.c.bf16 %v1304_v36, %v1302_v35  ;;  %s4259_s16 = sld [smem:[#allocation31_spill]]  ;;  %vm964_vm1 = vcmask 64512  }
 0x158   : > { %v2471_v45 = vpack.c.bf16 %v1303_v38, %v1301_v37  ;;  %v2473_v46 = vpack.c.bf16 %v1308_v40, %v1306_v39  ;;  %v1305_v47 = vld [vmem:[#allocation19 + $0x20] sm:$0xff]  ;;  %v1307_v48 = vld [vmem:[#allocation19 + $0x30] sm:$0xff]  ;;  %v1310_v49 = vld [vmem:[#allocation19 + $0x48] sm:$0xff]  ;;  %s4260_s26 = sld [smem:[#allocation38_spill]]  ;;  %s2287_s17 = sshll.u32 %s3660_s20, 6 }
 0x159   : > { %s4271_s1 = smov (!%p685_p4, %s2288_s1), 15  ;;  %v1312_v50 = vld [vmem:[#allocation19 + $0x58] sm:$0xff]  ;;  %v2475_v52 = vpack.c.bf16 %v1307_v48, %v1305_v47  ;;  %v1309_v54 = vld [vmem:[#allocation19 + $0x40] sm:$0xff]  ;;  %v1311_v55 = vld [vmem:[#allocation19 + $0x50] sm:$0xff]  ;;  %s683_s10 = scalar_lea.vmem [#allocation20], %s2287_s17 }
 0x15a   : > { %s2289_s0 = sshll.u32 %s4271_s1, 3  ;;  %v2477_v53 = vpack.c.bf16 %v1312_v50, %v1310_v49  ;;  %v1314_v57 = vld [vmem:[#allocation19 + $0x68] sm:$0xff]  ;;  %v1316_v58 = vld [vmem:[#allocation19 + $0x78] sm:$0xff]  ;;  %v2479_v61 = vpack.c.bf16 %v1311_v55, %v1309_v54  ;;  %v1313_v63 = vld [vmem:[#allocation19 + $0x60] sm:$0xff]  ;;  %s2080_s6 = sshll.u32 %s683_s10, 4  ;;  %s4144_s6 = int_to_ptr.vmem [resolvable:$true] %s2080_s6 }
 0x15b   : > { %v701_v1 = vld [vmem:[%s4257_s30 + $0x8] sm:$0xff]  ;;  %v700_v3 = vld [vmem:[%s4257_s30] sm:$0xff]  ;;  %v703_v12 = vld [vmem:[%s4257_s30 + $0x18] sm:$0xff]  ;;  %v2481_v62 = vpack.c.bf16 %v1316_v58, %v1314_v57  ;;  %s2316_s2 = sshll.u32 %s3358_s27, 10  ;;  %p4263_p3 = scmp.ne.s32.totalorder %s4241_s25, 0 }
 0x15c   : > { %v705_v2 = vld [vmem:[%s4257_s30 + $0x28] sm:$0xff]  ;;  %v704_v5 = vld [vmem:[%s4257_s30 + $0x20] sm:$0xff]  ;;  %v707_v13 = vld [vmem:[%s4257_s30 + $0x38] sm:$0xff]  ;;  %s688_s28 = scalar_lea.vmem %s4258_s18, %s2289_s0  ;;  %s4262_s0 = sld [smem:[#allocation39_spill]] }
 0x15d   : > { %v2453_v4 = vpack.c.bf16 %v705_v2, %v701_v1  ;;  %v709_v6 = vld [vmem:[%s4257_s30 + $0x48] sm:$0xff]  ;;  %v2455_v8 = vpack.c.bf16 %v704_v5, %v700_v3  ;;  %v708_v10 = vld [vmem:[%s4257_s30 + $0x40] sm:$0xff]  ;;  %v2461_v15 = vpack.c.bf16 %v707_v13, %v703_v12  ;;  %v702_v16 = vld [vmem:[%s4257_s30 + $0x10] sm:$0xff]  ;;  %s2067_s18 = scalar_lea.sflag [#allocation4], %s3660_s20  ;;  %s3249_s27 = smov [#allocation20]  }
 0x15e   : > { %v713_v7 = vld [vmem:[%s4257_s30 + $0x68] sm:$0xff]  ;;  %v712_v11 = vld [vmem:[%s4257_s30 + $0x60] sm:$0xff]  ;;  %v706_v17 = vld [vmem:[%s4257_s30 + $0x30] sm:$0xff]  ;;  %s3148_s17 = sshll.u32 %s3249_s27, 4  ;;  %s3149_s17 = int_to_ptr.vmem [resolvable:$false] %s3148_s17 }
 0x15f   : > { %v2457_v9 = vpack.c.bf16 %v713_v7, %v709_v6  ;;  %2454 = vmatprep.subr.bf16.mxu1 %v2453_v4  ;;  %v2459_v14 = vpack.c.bf16 %v712_v11, %v708_v10  ;;  %v711_v18 = vld [vmem:[%s4257_s30 + $0x58] sm:$0xff]  ;;  %v2463_v21 = vpack.c.bf16 %v706_v17, %v702_v16  ;;  %v710_v23 = vld [vmem:[%s4257_s30 + $0x50] sm:$0xff]  ;;  %v692_v27 = vld [vmem:[%s688_s28] sm:$0xff]  ;;  %s3150_s7 = scalar_lea.vmem %s3149_s17, 2048  ;;  %p3151_p0 = scmp.lt.s32.totalorder %s4144_s6, %s3149_s17 }
 0x160   : > { %2456 = vmatpush1.bf16.msra.mxu1 %v2455_v8  ;;  %v715_v19 = vld [vmem:[%s4257_s30 + $0x78] sm:$0xff]  ;;  %v714_v24 = vld [vmem:[%s4257_s30 + $0x70] sm:$0xff]  ;;  %873 = vperm.xlu0 %2784, %v692_v27   ;;  %v693_v29 = vld [vmem:[%s688_s28 + $0x8] sm:$0xff] }
 0x161   : > { %2458 = vmatprep.subr.bf16.mxu1 %v2457_v9  ;;  %v2465_v22 = vpack.c.bf16 %v715_v19, %v711_v18  ;;  %v2467_v25 = vpack.c.bf16 %v714_v24, %v710_v23  ;;  %v694_v28 = vld [vmem:[%s688_s28 + $0x10] sm:$0xff]  ;;  %v695_v30 = vld [vmem:[%s688_s28 + $0x18] sm:$0xff]  ;;  %v696_v31 = vld [vmem:[%s688_s28 + $0x20] sm:$0xff] }
 0x162   : > { %883 = vperm.xlu1 %2785, %v694_v28   ;;  %v697_v32 = vld [vmem:[%s688_s28 + $0x28] sm:$0xff]  ;;  %v698_v33 = vld [vmem:[%s688_s28 + $0x30] sm:$0xff]  ;;  %v699_v34 = vld [vmem:[%s688_s28 + $0x38] sm:$0xff]  ;;  %s4261_s28 = sld [smem:[#allocation37_spill]]  ;;  %s4149_s4 = scalar_lea.hbm %s4262_s0, %s2316_s2 }
 0x163   : > { %v862_v44 = vld [vmem:[%s4259_s16] sm:$0xff]  ;;  %v863_v51 = vld [vmem:[%s4259_s16 + $0x8] sm:$0xff]  ;;  %v864_v60 = vld [vmem:[%s4259_s16 + $0x10] sm:$0xff] }
 0x164   : > { %2460 = vmatpush1.bf16.msra.mxu1 %v2459_v14  ;;  %878 = vperm.xlu0 %2784, %v693_v29   ;;  %v1315_v1 = vld [vmem:[#allocation19 + $0x70] sm:$0xff]  ;;  %v1318_v2 = vld [vmem:[#allocation19 + $0x88] sm:$0xff]  ;;  %v1320_v3 = vld [vmem:[#allocation19 + $0x98] sm:$0xff] }
 0x165   : > { %2462 = vmatprep.subr.bf16.mxu1 %v2461_v15  ;;  %v865_v4 = vld [vmem:[%s4259_s16 + $0x18] sm:$0xff]  ;;  %v2483_v5 = vpack.c.bf16 %v1315_v1, %v1313_v63  ;;  %v2485_v6 = vpack.c.bf16 %v1320_v3, %v1318_v2  ;;  %v1317_v7 = vld [vmem:[#allocation19 + $0x80] sm:$0xff]  ;;  %v1322_v9 = vld [vmem:[#allocation19 + $0xa8] sm:$0xff] }
 0x166   : > { %888 = vperm.xlu1 %2785, %v695_v30   ;;  %v1319_v8 = vld [vmem:[#allocation19 + $0x90] sm:$0xff]  ;;  %v1324_v10 = vld [vmem:[#allocation19 + $0xb8] sm:$0xff]  ;;  %v1321_v14 = vld [vmem:[#allocation19 + $0xa0] sm:$0xff] }
 0x167   : > { %2290 = vmatmul.mubr.msk.f32.vlgmr.msra.gmra.mrb[0].mxu1 %vm716_vm0, %v691_v20  ;;  %v866_v11 = vld [vmem:[%s4259_s16 + $0x20] sm:$0xff]  ;;  %v2487_v12 = vpack.c.bf16 %v1319_v8, %v1317_v7  ;;  %v2489_v13 = vpack.c.bf16 %v1324_v10, %v1322_v9  ;;  %v1323_v15 = vld [vmem:[#allocation19 + $0xb0] sm:$0xff]  ;;  %v1326_v16 = vld [vmem:[#allocation19 + $0xc8] sm:$0xff] }
 0x168   : > { %2464 = vmatpush1.bf16.msra.mxu1 %v2463_v21  ;;  %855 = vmatprep.mubr.f32.mxu1 %v3247_v0  ;;  %v1328_v17 = vld [vmem:[#allocation19 + $0xd8] sm:$0xff]  ;;  %v867_v18 = vld [vmem:[%s4259_s16 + $0x28] sm:$0xff]  ;;  %v2491_v19 = vpack.c.bf16 %v1323_v15, %v1321_v14  ;;  %v1331_v29 = vld [vmem:[#allocation19 + $0xf0] sm:$0xff] }
 0x169   : > { %2466 = vmatprep.subr.bf16.mxu1 %v2465_v22  ;;  %893 = vperm.xlu0 %2784, %v696_v31   ;;  %v1325_v21 = vld [vmem:[#allocation19 + $0xc0] sm:$0xff]  ;;  %v1327_v22 = vld [vmem:[#allocation19 + $0xd0] sm:$0xff]  ;;  %v1330_v23 = vld [vmem:[#allocation19 + $0xe8] sm:$0xff] }
 0x16a   : > { %898 = vperm.xlu1 %2785, %v697_v32   ;;  %v1332_v24 = vld [vmem:[#allocation19 + $0xf8] sm:$0xff]  ;;  %v2495_v26 = vpack.c.bf16 %v1327_v22, %v1325_v21  ;;  %v1329_v28 = vld [vmem:[#allocation19 + $0xe0] sm:$0xff]  ;;  %v1334_v30 = vld [vmem:[#allocation19 + $0x108] sm:$0xff] }
 0x16b   : > { %v2497_v27 = vpack.c.bf16 %v1332_v24, %v1330_v23  ;;  %v1336_v31 = vld [vmem:[#allocation19 + $0x118] sm:$0xff]  ;;  %v1333_v35 = vld [vmem:[#allocation19 + $0x100] sm:$0xff]  ;;  %v1335_v36 = vld [vmem:[#allocation19 + $0x110] sm:$0xff] }
 0x16c   : > { %2468 = vmatpush1.bf16.msra.mxu1 %v2467_v25  ;;  %v868_v25 = vld [vmem:[%s4259_s16 + $0x30] sm:$0xff]  ;;  %v869_v32 = vld [vmem:[%s4259_s16 + $0x38] sm:$0xff]  ;;  %v2503_v39 = vpack.c.bf16 %v1335_v36, %v1333_v35  ;;  %v1341_v47 = vld [vmem:[#allocation19 + $0x140] sm:$0xff]  ;;  %v912_v35 = vlaneseq }
 0x16d   : > { %903 = vperm.xlu0 %2784, %v698_v33   ;;  %v2499_v33 = vpack.c.bf16 %v1331_v29, %v1329_v28  ;;  %v1338_v37 = vld [vmem:[#allocation19 + $0x128] sm:$0xff]  ;;  %v1340_v38 = vld [vmem:[#allocation19 + $0x138] sm:$0xff]  ;;  %v1343_v48 = vld [vmem:[#allocation19 + $0x150] sm:$0xff] }
 0x16e   : > { %908 = vperm.xlu1 %2785, %v699_v34   ;;  %v2501_v34 = vpack.c.bf16 %v1336_v31, %v1334_v30  ;;  %v2505_v40 = vpack.c.bf16 %v1340_v38, %v1338_v37  ;;  %v1346_v49 = vld [vmem:[#allocation19 + $0x168] sm:$0xff]  ;;  %v1348_v50 = vld [vmem:[#allocation19 + $0x178] sm:$0xff]  ;;  %v1347_v54 = vld [vmem:[#allocation19 + $0x170] sm:$0xff]  ;;  %v913_v36 = vshrl.u32 %v912_v35, 7 }
 0x16f   : > { %2291 = vmatmul.mubr.msk.f32.vlgmr.msra.gmra.mrb[2].mxu1 %vm716_vm0, %v691_v20  ;;  %v2493_v20 = vpack.c.bf16 %v1328_v17, %v1326_v16  ;;  %v1350_v55 = vld [vmem:[#allocation19 + $0x188] sm:$0xff]  ;;  %v1353_v2 = vld [vmem:[#allocation19 + $0x1a0] sm:$0xff]  ;;  %v1355_v3 = vld [vmem:[#allocation19 + $0x1b0] sm:$0xff] }
 0x170   : > { %1166 = vmatprep.mubr.f32.mxu1 %v3247_v0  ;;  %v1357_v8 = vld [vmem:[#allocation19 + $0x1c0] sm:$0xff]  ;;  %v1359_v9 = vld [vmem:[#allocation19 + $0x1d0] sm:$0xff]  ;;  %v3802_v37 = vsub.s32 0, %v913_v36 }
 0x171   : > { %v2527_v10 = vpack.c.bf16 %v1359_v9, %v1357_v8  ;;  %v1361_v14 = vld [vmem:[#allocation19 + $0x1e0] sm:$0xff]  ;;  %v1363_v15 = vld [vmem:[#allocation19 + $0x1f0] sm:$0xff] }
 0x172   : > { %v2531_v16 = vpack.c.bf16 %v1363_v15, %v1361_v14  ;;  %v1575_v17 = vld [vmem:[#allocation11 + $0x8] sm:$0xff]  ;;  %v1576_v21 = vld [vmem:[#allocation11 + $0x10] sm:$0xff]  ;;  %v1581_v23 = vld [vmem:[#allocation11 + $0x38] sm:$0xff] }
 0x173   : > { %v1579_v22 = vld [vmem:[#allocation11 + $0x28] sm:$0xff]  ;;  %v1585_v29 = vld [vmem:[#allocation11 + $0x58] sm:$0xff]  ;;  %v870_v38 = vld [vmem:[#allocation5] sm:$0xf] }
 0x174   : > { %v1583_v28 = vld [vmem:[#allocation11 + $0x48] sm:$0xff] }
 0x175   : > { %v2541_v31 = vpack.c.bf16 %v1585_v29, %v1583_v28 }
 0x23a   : > { %v786_v41 = vpop.f32.mrb[0].mxu1 }
 0x23b   : > { %v788_v43 = vpop.f32.mrb[1].mxu1 }
 0x23c   : > { %989 = vmatprep.subr.mxu0 %v788_v43  ;;  %v1342_v43 = vld [vmem:[#allocation19 + $0x148] sm:$0xff] }
 0x23d   : > { %990 = vmatpush1.msra.mxu0 %v786_v41  ;;  %v1337_v41 = vld [vmem:[#allocation19 + $0x120] sm:$0xff] }
 0x23e   : > { %2292 = vmatmul.mubr.msk.f32.vlgmr.msra.gmra.mrb[0].mxu0 %vm964_vm1, %v862_v44  ;;  %2470 = vmatprep.subr.bf16.mxu0 %v2469_v42  ;;  %v1339_v42 = vld [vmem:[#allocation19 + $0x130] sm:$0xff] }
 0x23f   : > { %1059 = vmatprep.mubr.f32.mxu0 %v3247_v0  ;;  %2472 = vmatpush1.bf16.msra.mxu0 %v2471_v45  ;;  %v2507_v45 = vpack.c.bf16 %v1339_v42, %v1337_v41  ;;  %v922_v41 = vsub.s32 2, %v913_v36 }
 0x240   : > { %2474 = vmatprep.subr.bf16.mxu0 %v2473_v46 }
 0x242   : > { %v857_v56 = vpop.f32.mrb[2].mxu1  ;;  %2293 = vmatmul.mubr.msk.f32.gmra.mrb[2].mxu0 %vm964_vm1, %v863_v51 }
 0x243   : > { %v859_v59 = vpop.f32.mrb[3].mxu1  ;;  %1065 = vmatprep.mubr.f32.mxu0 %v3247_v0  ;;  %2476 = vmatpush1.bf16.msra.mxu0 %v2475_v52  ;;  %v2513_v52 = vpack.c.bf16 %v1348_v50, %v1346_v49  ;;  %v1215_v49 = vld [vmem:[#allocation7] sm:$0xf] }
 0x244   : > { %1102 = vmatprep.subr.mxu1 %v859_v59  ;;  %2478 = vmatprep.subr.bf16.mxu0 %v2477_v53  ;;  %v1345_v53 = vld [vmem:[#allocation19 + $0x160] sm:$0xff] }
 0x245   : > { %1103 = vmatpush1.msra.mxu1 %v857_v56  ;;  %v1352_v56 = vld [vmem:[#allocation19 + $0x198] sm:$0xff]  ;;  %v2515_v57 = vpack.c.bf16 %v1347_v54, %v1345_v53  ;;  %v1349_v59 = vld [vmem:[#allocation19 + $0x180] sm:$0xff]  ;;  %v3819_v54 = vrot.slane %v1215_v49, %v3802_v37 }
 0x246   : > { %2294 = vmatmul.mubr.msk.f32.gmra.mrb[4].mxu0 %vm964_vm1, %v864_v60  ;;  %2300 = vmatmul.mubr.msk.f32.vlgmr.msra.gmra.mrb[4].mxu1 %vm964_vm1, %v862_v44  ;;  %v1344_v44 = vld [vmem:[#allocation19 + $0x158] sm:$0xff]  ;;  %v2517_v58 = vpack.c.bf16 %v1352_v56, %v1350_v55 }
 0x247   : > { %1071 = vmatprep.mubr.f32.mxu0 %v3247_v0  ;;  %1172 = vmatprep.mubr.f32.mxu1 %v3247_v0  ;;  %v2509_v46 = vpack.c.bf16 %v1344_v44, %v1342_v43  ;;  %v926_v43 = vsub.s32 3, %v913_v36  ;;  %v874_v44 = vpop.permute.xlu0 %873 }
 0x248   : > { %2480 = vmatpush1.bf16.msra.mxu0 %v2479_v61  ;;  %v1354_v61 = vld [vmem:[#allocation19 + $0x1a8] sm:$0xff] }
 0x249   : > { %2482 = vmatprep.subr.bf16.mxu0 %v2481_v62  ;;  %v1356_v62 = vld [vmem:[#allocation19 + $0x1b8] sm:$0xff] }
 0x24a   : > { %2295 = vmatmul.mubr.msk.f32.gmra.mrb[6].mxu0 %vm964_vm1, %v865_v4  ;;  %2301 = vmatmul.mubr.msk.f32.gmra.mrb[6].mxu1 %vm964_vm1, %v863_v51  ;;  %v2511_v51 = vpack.c.bf16 %v1343_v48, %v1341_v47  ;;  %v2521_v1 = vpack.c.bf16 %v1356_v62, %v1354_v61  ;;  %v3813_v47 = vrot.slane %v870_v38, %v922_v41  ;;  %v884_v61 = vpop.permute.xlu1 %883 }
 0x24b   : > { %1077 = vmatprep.mubr.f32.mxu0 %v3247_v0  ;;  %1178 = vmatprep.mubr.f32.mxu1 %v3247_v0  ;;  %v3826_v62 = vrot.slane %v1215_v49, %v922_v41 }
 0x24c   : > { %2484 = vmatpush1.bf16.msra.mxu0 %v2483_v5  ;;  %v1358_v5 = vld [vmem:[#allocation19 + $0x1c8] sm:$0xff]  ;;  %v934_v55 = vmul.f32 %v3813_v47, %v874_v44 }
 0x24d   : > { %2486 = vmatprep.subr.bf16.mxu0 %v2485_v6  ;;  %v1360_v6 = vld [vmem:[#allocation19 + $0x1d8] sm:$0xff] }
 0x24e   : > { %2296 = vmatmul.mubr.msk.f32.gmra.mrb[8].mxu0 %vm964_vm1, %v866_v11  ;;  %2302 = vmatmul.mubr.msk.f32.gmra.mrb[8].mxu1 %vm964_vm1, %v864_v60  ;;  %v1351_v60 = vld [vmem:[#allocation19 + $0x190] sm:$0xff]  ;;  %v2525_v7 = vpack.c.bf16 %v1360_v6, %v1358_v5  ;;  %v889_v28 = vpop.permute.xlu1 %888 }
 0x24f   : > { %1083 = vmatprep.mubr.f32.mxu0 %v3247_v0  ;;  %1184 = vmatprep.mubr.f32.mxu1 %v3247_v0  ;;  %v2519_v63 = vpack.c.bf16 %v1351_v60, %v1349_v59 }
 0x250   : > { %2488 = vmatpush1.bf16.msra.mxu0 %v2487_v12  ;;  %v1364_v12 = vld [vmem:[#allocation19 + $0x1f8] sm:$0xff] }
 0x251   : > { %2490 = vmatprep.subr.bf16.mxu0 %v2489_v13 }
 0x252   : > { %2297 = vmatmul.mubr.msk.f32.gmra.mrb[10].mxu0 %vm964_vm1, %v867_v18  ;;  %2303 = vmatmul.mubr.msk.f32.gmra.mrb[10].mxu1 %vm964_vm1, %v865_v4  ;;  %v2523_v4 = vpack.c.bf16 %v1355_v3, %v1353_v2  ;;  %v3829_v2 = vrot.slane %v1215_v49, %v926_v43 }
 0x253   : > { %1089 = vmatprep.mubr.f32.mxu0 %v3247_v0  ;;  %1190 = vmatprep.mubr.f32.mxu1 %v3247_v0 }
 0x254   : > { %2492 = vmatpush1.bf16.msra.mxu0 %v2491_v19  ;;  %v1574_v19 = vld [vmem:[#allocation11] sm:$0xff] }
 0x255   : > { %2494 = vmatprep.subr.bf16.mxu0 %v2493_v20  ;;  %v2535_v24 = vpack.c.bf16 %v1576_v21, %v1574_v19 }
 0x256   : > { %2298 = vmatmul.mubr.msk.f32.gmra.mrb[12].mxu0 %vm964_vm1, %v868_v25  ;;  %2304 = vmatmul.mubr.msk.f32.gmra.mrb[12].mxu1 %vm964_vm1, %v866_v11  ;;  %v1362_v11 = vld [vmem:[#allocation19 + $0x1e8] sm:$0xff] }
 0x257   : > { %1095 = vmatprep.mubr.f32.mxu0 %v3247_v0  ;;  %1196 = vmatprep.mubr.f32.mxu1 %v3247_v0  ;;  %v2529_v13 = vpack.c.bf16 %v1364_v12, %v1362_v11 }
 0x258   : > { %2496 = vmatpush1.bf16.msra.mxu0 %v2495_v26  ;;  %v1578_v26 = vld [vmem:[#allocation11 + $0x20] sm:$0xff] }
 0x259   : > { %2498 = vmatprep.subr.bf16.mxu0 %v2497_v27  ;;  %v1580_v27 = vld [vmem:[#allocation11 + $0x30] sm:$0xff] }
 0x25a   : > { %2299 = vmatmul.mubr.msk.f32.gmra.mrb[14].mxu0 %vm964_vm1, %v869_v32  ;;  %2305 = vmatmul.mubr.msk.f32.gmra.mrb[14].mxu1 %vm964_vm1, %v867_v18  ;;  %v1577_v18 = vld [vmem:[#allocation11 + $0x18] sm:$0xff]  ;;  %v2539_v30 = vpack.c.bf16 %v1580_v27, %v1578_v26  ;;  %v942_v26 = vmul.f32 %v3813_v47, %v884_v61 }
 0x25b   : > { %1202 = vmatprep.mubr.f32.mxu1 %v3247_v0  ;;  %v2533_v20 = vpack.c.bf16 %v1577_v18, %v1575_v17 }
 0x25c   : > { %2500 = vmatpush1.bf16.msra.mxu0 %v2499_v33  ;;  %v1584_v33 = vld [vmem:[#allocation11 + $0x50] sm:$0xff] }
 0x25d   : > { %2502 = vmatprep.subr.bf16.mxu0 %v2501_v34  ;;  %2534 = vmatprep.subr.bf16.mxu1 %v2533_v20 }
 0x25e   : > { %2306 = vmatmul.mubr.msk.f32.gmra.mrb[16].mxu1 %vm964_vm1, %v868_v25  ;;  %v2537_v25 = vpack.c.bf16 %v1581_v23, %v1579_v22 }
 0x25f   : > { %1208 = vmatprep.mubr.f32.mxu1 %v3247_v0  ;;  %2536 = vmatpush1.bf16.msra.mxu1 %v2535_v24 }
 0x260   : > { %2504 = vmatpush1.bf16.msra.mxu0 %v2503_v39  ;;  %2538 = vmatprep.subr.bf16.mxu1 %v2537_v25  ;;  %v3804_v39 = vsub.s32 1, %v913_v36 }
 0x261   : > { %2506 = vmatprep.subr.bf16.mxu0 %v2505_v40  ;;  %v3807_v40 = vrot.slane %v870_v38, %v3802_v37 }
 0x262   : > { %2307 = vmatmul.mubr.msk.f32.gmra.mrb[18].mxu1 %vm964_vm1, %v869_v32  ;;  %v1582_v32 = vld [vmem:[#allocation11 + $0x40] sm:$0xff]  ;;  %v3810_v42 = vrot.slane %v870_v38, %v3804_v39  ;;  %v3823_v59 = vrot.slane %v1215_v49, %v3804_v39 }
 0x263   : > { %1682 = vmatprep.mubr.f32.mxu1 %v3247_v0  ;;  %2540 = vmatpush1.bf16.msra.mxu1 %v2539_v30  ;;  %v2543_v34 = vpack.c.bf16 %v1584_v33, %v1582_v32  ;;  %v940_v8 = vmul.f32 %v3807_v40, %v884_v61 }
 0x264   : > { %2508 = vmatpush1.bf16.msra.mxu0 %v2507_v45  ;;  %2542 = vmatprep.subr.bf16.mxu1 %v2541_v31  ;;  %v933_v50 = vmul.f32 %v3810_v42, %v874_v44  ;;  %v941_v12 = vmul.f32 %v3810_v42, %v884_v61 }
 0x265   : > { %2510 = vmatprep.subr.bf16.mxu0 %v2509_v46  ;;  %v932_v46 = vmul.f32 %v3807_v40, %v874_v44 }
 0x267   : > { %2544 = vmatpush1.bf16.msra.mxu1 %v2543_v34  ;;  %v944_v34 = vmul.f32 %v3807_v40, %v889_v28 }
 0x268   : > { %2512 = vmatpush1.bf16.msra.mxu0 %v2511_v51  ;;  %v3816_v51 = vrot.slane %v870_v38, %v926_v43  ;;  %v945_v38 = vmul.f32 %v3810_v42, %v889_v28 }
 0x269   : > { %2514 = vmatprep.subr.bf16.mxu0 %v2513_v52 }
 0x26a   : > { %v935_v60 = vmul.f32 %v3816_v51, %v874_v44  ;;  %v943_v31 = vmul.f32 %v3816_v51, %v884_v61  ;;  %v946_v61 = vmul.f32 %v3813_v47, %v889_v28 }
 0x26c   : > { %2516 = vmatpush1.bf16.msra.mxu0 %v2515_v57  ;;  %v879_v57 = vpop.permute.xlu0 %878 }
 0x26d   : > { %2518 = vmatprep.subr.bf16.mxu0 %v2517_v58  ;;  %v937_v3 = vmul.f32 %v3810_v42, %v879_v57  ;;  %v938_v15 = vmul.f32 %v3813_v47, %v879_v57  ;;  %v939_v19 = vmul.f32 %v3816_v51, %v879_v57 }
 0x270   : > { %2520 = vmatpush1.bf16.msra.mxu0 %v2519_v63  ;;  %v936_v63 = vmul.f32 %v3807_v40, %v879_v57  ;;  %v894_v57 = vpop.permute.xlu0 %893 }
 0x271   : > { %2522 = vmatprep.subr.bf16.mxu0 %v2521_v1 }
 0x274   : > { %2524 = vmatpush1.bf16.msra.mxu0 %v2523_v4 }
 0x275   : > { %2526 = vmatprep.subr.bf16.mxu0 %v2525_v7 }
 0x278   : > { %2528 = vmatpush1.bf16.msra.mxu0 %v2527_v10 }
 0x279   : > { %2530 = vmatprep.subr.bf16.mxu0 %v2529_v13 }
 0x27c   : > { %2532 = vmatpush1.bf16.msra.mxu0 %v2531_v16 }
 0x311   : > { %v1055_v45 = vpop.f32.mrb[0].mxu0 }
 0x312   : > { %v1057_v48 = vpop.f32.mrb[1].mxu0  ;;  %v1056_v53 = vadd.f32 %v1055_v45, %v932_v46 }
 0x313   : > { %v1058_v58 = vadd.f32 %v1057_v48, %v933_v50 }
 0x314   : > { %v1237_v5 = vadd.f32 %v3819_v54, %v1056_v53 }
 0x315   : > { %v1061_v52 = vpop.f32.mrb[2].mxu0  ;;  %v1238_v10 = vadd.f32 %v3823_v59, %v1058_v58 }
 0x316   : > { %v1063_v56 = vpop.f32.mrb[3].mxu0  ;;  %v1062_v14 = vadd.f32 %v1061_v52, %v936_v63 }
 0x317   : > { %v1064_v17 = vadd.f32 %v1063_v56, %v937_v3 }
 0x318   : > { %v1241_v32 = vadd.f32 %v3819_v54, %v1062_v14 }
 0x319   : > { %v1168_v1 = vpop.f32.mrb[4].mxu1  ;;  %v1067_v4 = vpop.f32.mrb[4].mxu0  ;;  %v1242_v35 = vadd.f32 %v3823_v59, %v1064_v17 }
 0x31a   : > { %v1169_v6 = vadd.f32 %v1168_v1, %v934_v55  ;;  %v1170_v7 = vpop.f32.mrb[5].mxu1  ;;  %v1069_v9 = vpop.f32.mrb[5].mxu0  ;;  %v1068_v22 = vadd.f32 %v1067_v4, %v940_v8 }
 0x31b   : > { %v1171_v11 = vadd.f32 %v1170_v7, %v935_v60  ;;  %v1070_v29 = vadd.f32 %v1069_v9, %v941_v12  ;;  %v948_v7 = vmul.f32 %v3807_v40, %v894_v57  ;;  %v899_v17 = vpop.permute.xlu1 %898 }
 0x31c   : > { %v1239_v13 = vadd.f32 %v3826_v62, %v1169_v6  ;;  %v1245_v46 = vadd.f32 %v3819_v54, %v1068_v22  ;;  %v951_v22 = vmul.f32 %v3816_v51, %v894_v57 }
 0x31d   : > { %v1240_v16 = vadd.f32 %v3829_v2, %v1171_v11  ;;  %v1174_v18 = vpop.f32.mrb[6].mxu1  ;;  %v1073_v20 = vpop.f32.mrb[6].mxu0  ;;  %v1246_v53 = vadd.f32 %v3823_v59, %v1070_v29 }
 0x31e   : > { %v3840_v21 = vsub.f32 %v1237_v5, %v1239_v13  ;;  %v1175_v23 = vadd.f32 %v1174_v18, %v938_v15  ;;  %v1176_v24 = vpop.f32.mrb[7].mxu1  ;;  %v1075_v25 = vpop.f32.mrb[7].mxu0  ;;  %v1074_v58 = vadd.f32 %v1073_v20, %v944_v34  ;;  %v947_v5 = vmul.f32 %v3816_v51, %v889_v28 }
 0x31f   : > { %v3843_v27 = vsub.f32 %v1238_v10, %v1240_v16  ;;  %v1177_v30 = vadd.f32 %v1176_v24, %v939_v19  ;;  %v1076_v63 = vadd.f32 %v1075_v25, %v945_v38  ;;  %v949_v13 = vmul.f32 %v3810_v42, %v894_v57 }
 0x320   : > { %v1243_v33 = vadd.f32 %v3826_v62, %v1175_v23  ;;  %v1285_v45 = vmul.f32 %v3840_v21, %v3840_v21  ;;  %v950_v16 = vmul.f32 %v3813_v47, %v894_v57  ;;  %v1249_v18 = vadd.f32 %v3819_v54, %v1074_v58 }
 0x321   : > { %v1244_v36 = vadd.f32 %v3829_v2, %v1177_v30  ;;  %v1079_v41 = vpop.f32.mrb[8].mxu0  ;;  %v1180_v43 = vpop.f32.mrb[8].mxu1  ;;  %v1286_v44 = vmul.f32 %v3843_v27, %v3843_v27  ;;  %v1250_v23 = vadd.f32 %v3823_v59, %v1076_v63  ;;  %v952_v30 = vmul.f32 %v3807_v40, %v899_v17 }
 0x322   : > { %v3857_v48 = vsub.f32 %v1241_v32, %v1243_v33  ;;  %v1181_v49 = vadd.f32 %v1180_v43, %v942_v26  ;;  %v1081_v50 = vpop.f32.mrb[9].mxu0  ;;  %v1182_v52 = vpop.f32.mrb[9].mxu1  ;;  %v1080_v19 = vadd.f32 %v1079_v41, %v948_v7  ;;  %v953_v38 = vmul.f32 %v3810_v42, %v899_v17 }
 0x323   : > { %v3860_v55 = vsub.f32 %v1242_v35, %v1244_v36  ;;  %v1183_v56 = vadd.f32 %v1182_v52, %v943_v31  ;;  %1429 = vmatprep.mubr.f32.mxu0 %v1286_v44  ;;  %v1082_v24 = vadd.f32 %v1081_v50, %v949_v13  ;;  %v904_v36 = vpop.permute.xlu0 %903  ;;  %v954_v44 = vmul.f32 %v3813_v47, %v899_v17 }
 0x324   : > { %v1247_v60 = vadd.f32 %v3826_v62, %v1181_v49  ;;  %1430 = vmatmul.mubr.f32.vlgmr.msra.gmra.mrb[16].mxu0 %v1285_v45  ;;  %v1287_v12 = vmul.f32 %v3857_v48, %v3857_v48  ;;  %v1253_v45 = vadd.f32 %v3819_v54, %v1080_v19  ;;  %v955_v50 = vmul.f32 %v3816_v51, %v899_v17 }
 0x325   : > { %v1248_v1 = vadd.f32 %v3829_v2, %v1183_v56  ;;  %v1085_v3 = vpop.f32.mrb[10].mxu0  ;;  %v1186_v4 = vpop.f32.mrb[10].mxu1  ;;  %v1288_v6 = vmul.f32 %v3860_v55, %v3860_v55  ;;  %v1254_v52 = vadd.f32 %v3823_v59, %v1082_v24  ;;  %v957_v7 = vmul.f32 %v3810_v42, %v904_v36 }
 0x326   : > { %v3869_v8 = vsub.f32 %v1245_v46, %v1247_v60  ;;  %v1187_v9 = vadd.f32 %v1186_v4, %v946_v61  ;;  %v1087_v10 = vpop.f32.mrb[11].mxu0  ;;  %v1188_v11 = vpop.f32.mrb[11].mxu1  ;;  %v1086_v46 = vadd.f32 %v1085_v3, %v952_v30  ;;  %v956_v61 = vmul.f32 %v3807_v40, %v904_v36 }
 0x327   : > { %v3874_v14 = vsub.f32 %v1246_v53, %v1248_v1  ;;  %v1189_v15 = vadd.f32 %v1188_v11, %v947_v5  ;;  %1435 = vmatprep.mubr.f32.mxu0 %v1288_v6  ;;  %v1088_v53 = vadd.f32 %v1087_v10, %v953_v38  ;;  %v909_v6 = vpop.permute.xlu1 %908  ;;  %v958_v11 = vmul.f32 %v3813_v47, %v904_v36 }
 0x328   : > { %v1251_v20 = vadd.f32 %v3826_v62, %v1187_v9  ;;  %1436 = vmatmul.mubr.f32.gmra.mrb[18].mxu0 %v1287_v12  ;;  %v1289_v35 = vmul.f32 %v3869_v8, %v3869_v8  ;;  %v1257_v12 = vadd.f32 %v3819_v54, %v1086_v46 }
 0x329   : > { %v1252_v25 = vadd.f32 %v3829_v2, %v1189_v15  ;;  %v1091_v26 = vpop.f32.mrb[12].mxu0  ;;  %v1192_v28 = vpop.f32.mrb[12].mxu1  ;;  %v1290_v29 = vmul.f32 %v3874_v14, %v3874_v14  ;;  %v1258_v17 = vadd.f32 %v3823_v59, %v1088_v53 }
 0x32a   : > { %v3885_v31 = vsub.f32 %v1249_v18, %v1251_v20  ;;  %v1193_v32 = vadd.f32 %v1192_v28, %v950_v16  ;;  %v1093_v33 = vpop.f32.mrb[13].mxu0  ;;  %v1194_v34 = vpop.f32.mrb[13].mxu1  ;;  %v1092_v13 = vadd.f32 %v1091_v26, %v956_v61  ;;  %v959_v16 = vmul.f32 %v3816_v51, %v904_v36 }
 0x32b   : > { %v3890_v41 = vsub.f32 %v1250_v23, %v1252_v25  ;;  %v1195_v43 = vadd.f32 %v1194_v34, %v951_v22  ;;  %1441 = vmatprep.mubr.f32.mxu0 %v1290_v29  ;;  %v1094_v18 = vadd.f32 %v1093_v33, %v957_v7  ;;  %v960_v23 = vmul.f32 %v3807_v40, %v909_v6 }
 0x32c   : > { %v1255_v49 = vadd.f32 %v3826_v62, %v1193_v32  ;;  %1442 = vmatmul.mubr.f32.gmra.mrb[20].mxu0 %v1289_v35  ;;  %v1291_v5 = vmul.f32 %v3885_v31, %v3885_v31  ;;  %v961_v29 = vmul.f32 %v3810_v42, %v909_v6  ;;  %v962_v33 = vmul.f32 %v3813_v47, %v909_v6 }
 0x32d   : > { %v1256_v56 = vadd.f32 %v3829_v2, %v1195_v43  ;;  %v1097_v57 = vpop.f32.mrb[14].mxu0  ;;  %v1198_v58 = vpop.f32.mrb[14].mxu1  ;;  %v1292_v60 = vmul.f32 %v3890_v41, %v3890_v41  ;;  %v1261_v34 = vadd.f32 %v3819_v54, %v1092_v13  ;;  %v963_v36 = vmul.f32 %v3816_v51, %v909_v6  ;;  %v1588_v6 = vld [vmem:[#allocation11 + $0x70] sm:$0xff]  ;;  %v1590_v13 = vld [vmem:[#allocation11 + $0x80] sm:$0xff] }
 0x32e   : > { %v3901_v63 = vsub.f32 %v1253_v45, %v1255_v49  ;;  %v1199_v1 = vadd.f32 %v1198_v58, %v954_v44  ;;  %v1099_v3 = vpop.f32.mrb[15].mxu0  ;;  %v1200_v4 = vpop.f32.mrb[15].mxu1  ;;  %v1098_v35 = vadd.f32 %v1097_v57, %v960_v23  ;;  %v1262_v38 = vadd.f32 %v3823_v59, %v1094_v18  ;;  %v1597_v18 = vld [vmem:[#allocation11 + $0xb8] sm:$0xff] }
 0x32f   : > { %v3906_v9 = vsub.f32 %v1254_v52, %v1256_v56  ;;  %v1201_v10 = vadd.f32 %v1200_v4, %v955_v50  ;;  %1447 = vmatprep.mubr.f32.mxu0 %v1292_v60  ;;  %v1100_v43 = vadd.f32 %v1099_v3, %v961_v29  ;;  %v1598_v29 = vld [vmem:[#allocation11 + $0xc0] sm:$0xff] }
 0x330   : > { %v1259_v15 = vadd.f32 %v3826_v62, %v1199_v1  ;;  %1448 = vmatmul.mubr.f32.gmra.mrb[22].mxu0 %v1291_v5  ;;  %v1293_v28 = vmul.f32 %v3901_v63, %v3901_v63  ;;  %v1265_v51 = vadd.f32 %v3819_v54, %v1098_v35  ;;  %v1586_v5 = vld [vmem:[#allocation11 + $0x60] sm:$0xff]  ;;  %v1605_v35 = vld [vmem:[#allocation11 + $0xf8] sm:$0xff] }
 0x331   : > { %v1260_v19 = vadd.f32 %v3829_v2, %v1201_v10  ;;  %v1204_v20 = vpop.f32.mrb[16].mxu1  ;;  %v1294_v22 = vmul.f32 %v3906_v9, %v3906_v9  ;;  %v1266_v57 = vadd.f32 %v3823_v59, %v1100_v43  ;;  %v2547_v7 = vpack.c.bf16 %v1588_v6, %v1586_v5  ;;  %v1591_v10 = vld [vmem:[#allocation11 + $0x88] sm:$0xff] }
 0x332   : > { %v3917_v24 = vsub.f32 %v1257_v12, %v1259_v15  ;;  %v1205_v25 = vadd.f32 %v1204_v20, %v958_v11  ;;  %v1206_v26 = vpop.f32.mrb[17].mxu1  ;;  %v1593_v11 = vld [vmem:[#allocation11 + $0x98] sm:$0xff]  ;;  %v1592_v15 = vld [vmem:[#allocation11 + $0x90] sm:$0xff]  ;;  %v1594_v20 = vld [vmem:[#allocation11 + $0xa0] sm:$0xff] }
 0x333   : > { %v3922_v30 = vsub.f32 %v1258_v17, %v1260_v19  ;;  %v1207_v32 = vadd.f32 %v1206_v26, %v959_v16  ;;  %1453 = vmatprep.mubr.f32.mxu0 %v1294_v22  ;;  %v2549_v12 = vpack.c.bf16 %v1593_v11, %v1591_v10  ;;  %v2551_v16 = vpack.c.bf16 %v1592_v15, %v1590_v13  ;;  %v1595_v17 = vld [vmem:[#allocation11 + $0xa8] sm:$0xff]  ;;  %v1596_v22 = vld [vmem:[#allocation11 + $0xb0] sm:$0xff]  ;;  %v1601_v26 = vld [vmem:[#allocation11 + $0xd8] sm:$0xff] }
 0x334   : > { %v1263_v40 = vadd.f32 %v3826_v62, %v1205_v25  ;;  %1454 = vmatmul.mubr.f32.gmra.mrb[24].mxu0 %v1293_v28  ;;  %v1295_v50 = vmul.f32 %v3917_v24, %v3917_v24  ;;  %v2553_v19 = vpack.c.bf16 %v1597_v18, %v1595_v17  ;;  %v2555_v23 = vpack.c.bf16 %v1596_v22, %v1594_v20  ;;  %v1599_v25 = vld [vmem:[#allocation11 + $0xc8] sm:$0xff] }
 0x335   : > { %v1264_v44 = vadd.f32 %v3829_v2, %v1207_v32  ;;  %v1210_v42 = vpop.f32.mrb[18].mxu1  ;;  %v1296_v45 = vmul.f32 %v3922_v30, %v3922_v30  ;;  %v2557_v28 = vpack.c.bf16 %v1601_v26, %v1599_v25  ;;  %v1600_v32 = vld [vmem:[#allocation11 + $0xd0] sm:$0xff]  ;;  %v1750_v26 = vld [vmem:[%s4260_s26 + $0x18] sm:$0xff] }
 0x336   : > { %v3932_v46 = vsub.f32 %v1261_v34, %v1263_v40  ;;  %v1211_v47 = vadd.f32 %v1210_v42, %v962_v33  ;;  %v1212_v49 = vpop.f32.mrb[19].mxu1  ;;  %v2559_v33 = vpack.c.bf16 %v1600_v32, %v1598_v29  ;;  %v1603_v34 = vld [vmem:[#allocation11 + $0xe8] sm:$0xff] }
 0x337   : > { %v3936_v52 = vsub.f32 %v1262_v38, %v1264_v44  ;;  %v1213_v53 = vadd.f32 %v1212_v49, %v963_v36  ;;  %1459 = vmatprep.mubr.f32.mxu0 %v1296_v45  ;;  %v2561_v40 = vpack.c.bf16 %v1605_v35, %v1603_v34  ;;  %v1602_v36 = vld [vmem:[#allocation11 + $0xe0] sm:$0xff]  ;;  %v1604_v38 = vld [vmem:[#allocation11 + $0xf0] sm:$0xff] }
 0x338   : > { %v1267_v56 = vadd.f32 %v3826_v62, %v1211_v47  ;;  %1460 = vmatmul.mubr.f32.gmra.mrb[26].mxu0 %v1295_v50  ;;  %v1297_v1 = vmul.f32 %v3932_v46, %v3932_v46  ;;  %v1587_v62 = vld [vmem:[#allocation11 + $0x68] sm:$0xff]  ;;  %v2563_v43 = vpack.c.bf16 %v1604_v38, %v1602_v36 }
 0x339   : > { %v1268_v58 = vadd.f32 %v3829_v2, %v1213_v53  ;;  %v1298_v60 = vmul.f32 %v3936_v52, %v3936_v52  ;;  %v1589_v2 = vld [vmem:[#allocation11 + $0x78] sm:$0xff]  ;;  %v1747_v44 = vld [vmem:[%s4260_s26] sm:$0xff]  ;;  %v1748_v42 = vld [vmem:[%s4260_s26 + $0x8] sm:$0xff] }
 0x33a   : > { %v3944_v61 = vsub.f32 %v1265_v51, %v1267_v56  ;;  %v2545_v4 = vpack.c.bf16 %v1589_v2, %v1587_v62  ;;  %v3960_v45 = vpack.c.bf16 %v1748_v42, %v1747_v44  ;;  %v1538_v2 = vld [vmem:[#allocation10] sm:$0x3] }
 0x33b   : > { %v3948_v3 = vsub.f32 %v1266_v57, %v1268_v58  ;;  %1465 = vmatprep.mubr.f32.mxu0 %v1298_v60  ;;  %v3975_v18 = vrot.slane %v1538_v2, %v3804_v39 }
 0x33c   : > { %1466 = vmatmul.mubr.f32.gmra.mrb[28].mxu0 %v1297_v1  ;;  %v1299_v59 = vmul.f32 %v3944_v61, %v3944_v61  ;;  %2546 = vmatprep.subr.bf16.mxu1 %v2545_v4  ;;  %v1510_v1 = vld [vmem:[#allocation8] sm:$0x3] }
 0x33d   : > { %v1300_v54 = vmul.f32 %v3948_v3, %v3948_v3  ;;  %2548 = vmatpush1.bf16.msra.mxu1 %v2547_v7  ;;  %v3964_v4 = vrot.slane %v1510_v1, %v3802_v37  ;;  %v3967_v7 = vrot.slane %v1510_v1, %v3804_v39 }
 0x33e   : > { %2550 = vmatprep.subr.bf16.mxu1 %v2549_v12 }
 0x33f   : > { %1471 = vmatprep.mubr.f32.mxu0 %v1300_v54 }
 0x340   : > { %1472 = vmatmul.mubr.f32.gmra.mrb[30].mxu0 %v1299_v59 }
 0x341   : > { %2552 = vmatpush1.bf16.msra.mxu1 %v2551_v16  ;;  %v3971_v16 = vrot.slane %v1538_v2, %v3802_v37 }
 0x342   : > { %2554 = vmatprep.subr.bf16.mxu1 %v2553_v19 }
 0x345   : > { %2556 = vmatpush1.bf16.msra.mxu1 %v2555_v23 }
 0x346   : > { %2558 = vmatprep.subr.bf16.mxu1 %v2557_v28 }
 0x349   : > { %2560 = vmatpush1.bf16.msra.mxu1 %v2559_v33 }
 0x34a   : > { %2562 = vmatprep.subr.bf16.mxu1 %v2561_v40 }
 0x34d   : > { %2564 = vmatpush1.bf16.msra.mxu1 %v2563_v43 }
 0x34e   : > { %2566 = vmatprep.subr.bf16.mxu1 %v3960_v45 }
 0x3f7   : > { %v1431_v47 = vpop.f32.mrb[16].mxu0 }
 0x3f8   : > { %v1432_v49 = vadd.f32 1e-05, %v1431_v47  ;;  %v1433_v50 = vpop.f32.mrb[17].mxu0 }
 0x3f9   : > { %v1434_v53 = vadd.f32 1e-05, %v1433_v50 }
 0x3fa   : > { %2786 = vrsqrt.f32 %v1432_v49 }
 0x3fb   : > { %2788 = vrsqrt.f32 %v1434_v53  ;;  %v1437_v51 = vpop.f32.mrb[18].mxu0 }
 0x3fc   : > { %v1438_v56 = vadd.f32 1e-05, %v1437_v51  ;;  %v1439_v57 = vpop.f32.mrb[19].mxu0 }
 0x3fd   : > { %v1440_v58 = vadd.f32 1e-05, %v1439_v57 }
 0x3fe   : > { %2790 = vrsqrt.f32 %v1438_v56 }
 0x3ff   : > { %2792 = vrsqrt.f32 %v1440_v58  ;;  %v1443_v60 = vpop.f32.mrb[20].mxu0 }
 0x400   : > { %v1444_v54 = vadd.f32 1e-05, %v1443_v60  ;;  %v1445_v59 = vpop.f32.mrb[21].mxu0 }
 0x401   : > { %v1446_v62 = vadd.f32 1e-05, %v1445_v59 }
 0x402   : > { %2794 = vrsqrt.f32 %v1444_v54 }
 0x403   : > { %2796 = vrsqrt.f32 %v1446_v62  ;;  %v1449_v5 = vpop.f32.mrb[22].mxu0 }
 0x404   : > { %v2787_v6 = vpop.eup %2786  ;;  %v1450_v10 = vadd.f32 1e-05, %v1449_v5  ;;  %v1451_v11 = vpop.f32.mrb[23].mxu0  ;;  %v1753_v5 = vld [vmem:[%s4260_s26 + $0x30] sm:$0xff] }
 0x405   : > { %v2789_v12 = vpop.eup %2788  ;;  %v1494_v13 = vmul.f32 %v2787_v6, %v3840_v21  ;;  %v1452_v15 = vadd.f32 1e-05, %v1451_v11  ;;  %v1749_v21 = vld [vmem:[%s4260_s26 + $0x10] sm:$0xff] }
 0x406   : > { %2798 = vrsqrt.f32 %v1450_v10  ;;  %v1495_v17 = vmul.f32 %v2789_v12, %v3843_v27  ;;  %v2569_v43 = vpack.c.bf16 %v1750_v26, %v1749_v21  ;;  %v1756_v26 = vld [vmem:[%s4260_s26 + $0x48] sm:$0xff] }
 0x407   : > { %v1522_v19 = vmul.f32 %v3964_v4, %v1494_v13  ;;  %2800 = vrsqrt.f32 %v1452_v15  ;;  %v1455_v20 = vpop.f32.mrb[24].mxu0 }
 0x408   : > { %v2791_v22 = vpop.eup %2790  ;;  %v1456_v23 = vadd.f32 1e-05, %v1455_v20  ;;  %v1457_v25 = vpop.f32.mrb[25].mxu0  ;;  %v1523_v27 = vmul.f32 %v3967_v7, %v1495_v17 }
 0x409   : > { %v2793_v28 = vpop.eup %2792  ;;  %v1458_v29 = vadd.f32 1e-05, %v1457_v25  ;;  %v1550_v32 = vadd.f32 %v3971_v16, %v1522_v19  ;;  %v1496_v33 = vmul.f32 %v2791_v22, %v3857_v48  ;;  %v1751_v48 = vld [vmem:[%s4260_s26 + $0x20] sm:$0xff] }
 0x40a   : > { %v1497_v34 = vmul.f32 %v2793_v28, %v3860_v55  ;;  %2802 = vrsqrt.f32 %v1456_v23  ;;  %v3989_v35 = vadd.f32 %v3975_v18, %v1523_v27  ;;  %v1752_v55 = vld [vmem:[%s4260_s26 + $0x28] sm:$0xff] }
 0x40b   : > { %2804 = vrsqrt.f32 %v1458_v29  ;;  %v1461_v40 = vpop.f32.mrb[26].mxu0  ;;  %v1566_v36 = vmax.f32 %v1550_v32, 0.0  ;;  %v1524_v38 = vmul.f32 %v3964_v4, %v1496_v33  ;;  %v2573_v59 = vpack.c.bf16 %v1752_v55, %v1751_v48 }
 0x40c   : > { %v2795_v44 = vpop.eup %2794  ;;  %v1525_v42 = vmul.f32 %v3967_v7, %v1497_v34  ;;  %v1462_v47 = vadd.f32 1e-05, %v1461_v40  ;;  %v1463_v49 = vpop.f32.mrb[27].mxu0 }
 0x40d   : > { %v2797_v50 = vpop.eup %2796  ;;  %v1464_v53 = vadd.f32 1e-05, %v1463_v49  ;;  %1683 = vmatmul.mubr.f32.vlgmr.msra.gmra.mrb[20].mxu1 %v1566_v36  ;;  %v1552_v51 = vadd.f32 %v3971_v16, %v1524_v38  ;;  %v1498_v56 = vmul.f32 %v2795_v44, %v3869_v8 }
 0x40e   : > { %2806 = vrsqrt.f32 %v1462_v47  ;;  %1688 = vmatprep.mubr.f32.mxu1 %v3247_v0  ;;  %2568 = vmatpush3.bf16.msra.mxu1 %v3960_v45  ;;  %v4004_v57 = vadd.f32 %v3975_v18, %v1525_v42  ;;  %v1499_v58 = vmul.f32 %v2797_v50, %v3874_v14  ;;  %v1754_v45 = vld [vmem:[%s4260_s26 + $0x38] sm:$0xff] }
 0x40f   : > { %2808 = vrsqrt.f32 %v1464_v53  ;;  %v1467_v60 = vpop.f32.mrb[28].mxu0  ;;  %v1567_v1 = vmax.f32 %v1552_v51, 0.0  ;;  %v1526_v54 = vmul.f32 %v3964_v4, %v1498_v56  ;;  %2570 = vmatprep.subr.bf16.mxu1 %v2569_v43  ;;  %v2577_v22 = vpack.c.bf16 %v1754_v45, %v1753_v5 }
 0x410   : > { %v2799_v62 = vpop.eup %2798  ;;  %v1468_v2 = vadd.f32 1e-05, %v1467_v60  ;;  %v1469_v8 = vpop.f32.mrb[29].mxu0  ;;  %v1527_v14 = vmul.f32 %v3967_v7, %v1499_v58 }
 0x411   : > { %v2801_v6 = vpop.eup %2800  ;;  %v1470_v10 = vadd.f32 1e-05, %v1469_v8  ;;  %1689 = vmatmul.mubr.f32.gmra.mrb[22].mxu1 %v1567_v1  ;;  %v1554_v11 = vadd.f32 %v3971_v16, %v1526_v54  ;;  %v1500_v12 = vmul.f32 %v2799_v62, %v3885_v31  ;;  %v1755_v31 = vld [vmem:[%s4260_s26 + $0x40] sm:$0xff] }
 0x412   : > { %2810 = vrsqrt.f32 %v1468_v2  ;;  %1694 = vmatprep.mubr.f32.mxu1 %v3247_v0  ;;  %2572 = vmatpush3.bf16.msra.mxu1 %v2569_v43  ;;  %v4019_v13 = vadd.f32 %v3975_v18, %v1527_v14  ;;  %v1501_v15 = vmul.f32 %v2801_v6, %v3890_v41  ;;  %v2581_v38 = vpack.c.bf16 %v1756_v26, %v1755_v31 }
 0x413   : > { %2812 = vrsqrt.f32 %v1470_v10  ;;  %v1473_v17 = vpop.f32.mrb[30].mxu0  ;;  %v1568_v19 = vmax.f32 %v1554_v11, 0.0  ;;  %v1528_v20 = vmul.f32 %v3964_v4, %v1500_v12  ;;  %2574 = vmatprep.subr.bf16.mxu1 %v2573_v59  ;;  %v1757_v11 = vld [vmem:[%s4260_s26 + $0x50] sm:$0xff]  ;;  %v1762_v12 = vld [vmem:[%s4260_s26 + $0x78] sm:$0xff] }
 0x414   : > { %v2803_v23 = vpop.eup %2802  ;;  %v1474_v25 = vadd.f32 1e-05, %v1473_v17  ;;  %v1475_v21 = vpop.f32.mrb[31].mxu0  ;;  %v1529_v41 = vmul.f32 %v3967_v7, %v1501_v15  ;;  %v1930_v17 = vld [vmem:[#allocation16] sm:$0xff] }
 0x415   : > { %v2805_v27 = vpop.eup %2804  ;;  %v1476_v28 = vadd.f32 1e-05, %v1475_v21  ;;  %1695 = vmatmul.mubr.f32.gmra.mrb[24].mxu1 %v1568_v19  ;;  %v1556_v29 = vadd.f32 %v3971_v16, %v1528_v20  ;;  %v1502_v32 = vmul.f32 %v2803_v23, %v3901_v63  ;;  %v1931_v19 = vld [vmem:[#allocation16 + $0x8] sm:$0xff]  ;;  %v1932_v20 = vld [vmem:[#allocation16 + $0x10] sm:$0xff]  ;;  %v1933_v23 = vld [vmem:[#allocation16 + $0x18] sm:$0xff] }
 0x416   : > { %2814 = vrsqrt.f32 %v1474_v25  ;;  %1700 = vmatprep.mubr.f32.mxu1 %v3247_v0  ;;  %2576 = vmatpush3.bf16.msra.mxu1 %v2573_v59  ;;  %v4034_v33 = vadd.f32 %v3975_v18, %v1529_v41  ;;  %v1503_v34 = vmul.f32 %v2805_v27, %v3906_v9  ;;  %v2601_v25 = vpack.c.bf16 %v1933_v23, %v1932_v20  ;;  %v1606_v21 = vld [vmem:[#allocation13] sm:$0x3]  ;;  %v1935_v20 = vld [vmem:[#allocation16 + $0x28] sm:$0xff]  ;;  %v1936_v23 = vld [vmem:[#allocation16 + $0x30] sm:$0xff] }
 0x417   : > { %2816 = vrsqrt.f32 %v1476_v28  ;;  %v1569_v40 = vmax.f32 %v1556_v29, 0.0  ;;  %v1530_v36 = vmul.f32 %v3964_v4, %v1502_v32  ;;  %2578 = vmatprep.subr.bf16.mxu1 %v2577_v22  ;;  %v1611_v31 = vrot.slane %v1606_v21, %v3802_v37 }
 0x418   : > { %v2807_v43 = vpop.eup %2806  ;;  %v1531_v44 = vmul.f32 %v3967_v7, %v1503_v34  ;;  %v1615_v26 = vrot.slane %v1606_v21, %v3804_v39 }
 0x419   : > { %v2809_v42 = vpop.eup %2808  ;;  %1701 = vmatmul.mubr.f32.gmra.mrb[26].mxu1 %v1569_v40  ;;  %v1558_v63 = vadd.f32 %v3971_v16, %v1530_v36  ;;  %v1504_v47 = vmul.f32 %v2807_v43, %v3917_v24 }
 0x41a   : > { %1706 = vmatprep.mubr.f32.mxu1 %v3247_v0  ;;  %2580 = vmatpush3.bf16.msra.mxu1 %v2577_v22  ;;  %v4043_v9 = vadd.f32 %v3975_v18, %v1531_v44  ;;  %v1505_v49 = vmul.f32 %v2809_v42, %v3922_v30  ;;  %v2597_v22 = vpack.c.bf16 %v1931_v19, %v1930_v17  ;;  %v1934_v19 = vld [vmem:[#allocation16 + $0x20] sm:$0xff] }
 0x41b   : > { %v1570_v48 = vmax.f32 %v1558_v63, 0.0  ;;  %v1532_v55 = vmul.f32 %v3964_v4, %v1504_v47  ;;  %2582 = vmatprep.subr.bf16.mxu1 %v2581_v38 }
 0x41c   : > { %v2811_v50 = vpop.eup %2810  ;;  %v1533_v53 = vmul.f32 %v3967_v7, %v1505_v49  ;;  %2598 = vmatprep.subr.bf16.mxu0 %v2597_v22 }
 0x41d   : > { %v2813_v51 = vpop.eup %2812  ;;  %1707 = vmatmul.mubr.f32.gmra.mrb[28].mxu1 %v1570_v48  ;;  %v1560_v56 = vadd.f32 %v3971_v16, %v1532_v55  ;;  %v1506_v24 = vmul.f32 %v2811_v50, %v3932_v46  ;;  %2600 = vmatpush3.bf16.msra.mxu0 %v2597_v22  ;;  %v2605_v22 = vpack.c.bf16 %v1935_v20, %v1934_v19 }
 0x41e   : > { %1712 = vmatprep.mubr.f32.mxu1 %v3247_v0  ;;  %2584 = vmatpush3.bf16.msra.mxu1 %v2581_v38  ;;  %v4052_v58 = vadd.f32 %v3975_v18, %v1533_v53  ;;  %v1507_v30 = vmul.f32 %v2813_v51, %v3936_v52 }
 0x41f   : > { %v1571_v60 = vmax.f32 %v1560_v56, 0.0  ;;  %v1534_v1 = vmul.f32 %v3964_v4, %v1506_v24  ;;  %2602 = vmatprep.subr.bf16.mxu0 %v2601_v25 }
 0x420   : > { %v2815_v54 = vpop.eup %2814  ;;  %v1535_v59 = vmul.f32 %v3967_v7, %v1507_v30 }
 0x421   : > { %v2817_v62 = vpop.eup %2816  ;;  %1713 = vmatmul.mubr.f32.gmra.mrb[30].mxu1 %v1571_v60  ;;  %v1562_v2 = vadd.f32 %v3971_v16, %v1534_v1  ;;  %v1508_v46 = vmul.f32 %v2815_v54, %v3944_v61  ;;  %2604 = vmatpush3.bf16.msra.mxu0 %v2601_v25  ;;  %v1937_v25 = vld [vmem:[#allocation16 + $0x38] sm:$0xff] }
 0x422   : > { %1718 = vmatprep.mubr.f32.mxu1 %v3247_v0  ;;  %v4061_v8 = vadd.f32 %v3975_v18, %v1535_v59  ;;  %v1509_v5 = vmul.f32 %v2817_v62, %v3948_v3  ;;  %v1758_v3 = vld [vmem:[%s4260_s26 + $0x58] sm:$0xff]  ;;  %2606 = vmatprep.subr.bf16.mxu0 %v2605_v22  ;;  %v2609_v21 = vpack.c.bf16 %v1937_v25, %v1936_v23 }
 0x423   : > { %v1572_v52 = vmax.f32 %v1562_v2, 0.0  ;;  %v1536_v45 = vmul.f32 %v3964_v4, %v1508_v46  ;;  %v2585_v4 = vpack.c.bf16 %v1758_v3, %v1757_v11 }
 0x424   : > { %v1537_v14 = vmul.f32 %v3967_v7, %v1509_v5  ;;  %v1760_v7 = vld [vmem:[%s4260_s26 + $0x68] sm:$0xff] }
 0x425   : > { %1719 = vmatmul.mubr.f32.gmra.mrb[32].mxu1 %v1572_v52  ;;  %v1564_v6 = vadd.f32 %v3971_v16, %v1536_v45  ;;  %2586 = vmatprep.subr.bf16.mxu1 %v2585_v4 }
 0x426   : > { %1724 = vmatprep.mubr.f32.mxu1 %v3247_v0  ;;  %v4069_v10 = vadd.f32 %v3975_v18, %v1537_v14  ;;  %2588 = vmatpush3.bf16.msra.mxu1 %v2585_v4  ;;  %v1759_v0 = vld [vmem:[%s4260_s26 + $0x60] sm:$0xff]  ;;  %v1761_v18 = vld [vmem:[%s4260_s26 + $0x70] sm:$0xff] }
 0x427   : > { %v1573_v61 = vmax.f32 %v1564_v6, 0.0  ;;  %v2589_v16 = vpack.c.bf16 %v1760_v7, %v1759_v0  ;;  %v2593_v15 = vpack.c.bf16 %v1762_v12, %v1761_v18  ;;  %2608 = vmatpush3.bf16.msra.mxu0 %v2605_v22 }
 0x428   : > { %2610 = vmatprep.subr.bf16.mxu0 %v2609_v21 }
 0x429   : > { %1725 = vmatmul.mubr.f32.gmra.mrb[34].mxu1 %v1573_v61  ;;  %2590 = vmatprep.subr.bf16.mxu1 %v2589_v16 }
 0x42a   : > { %2592 = vmatpush3.bf16.msra.mxu1 %v2589_v16 }
 0x42b   : > { %2594 = vmatprep.subr.bf16.mxu1 %v2593_v15  ;;  %2612 = vmatpush3.bf16.msra.mxu0 %v2609_v21 }
 0x42e   : > { %2596 = vmatpush3.bf16.msra.mxu1 %v2593_v15 }
 0x4e0   : > { %v1684_v41 = vpop.f32.mrb[20].mxu1 }
 0x4e1   : > { %v1685_v27 = vadd.f32 %v1684_v41, %v1611_v31  ;;  %v1686_v28 = vpop.f32.mrb[21].mxu1 }
 0x4e2   : > { %v1687_v29 = vadd.f32 %v1686_v28, %v1615_v26  ;;  %v1941_v28 = vld [vmem:[#allocation16 + $0x58] sm:$0xff] }
 0x4e4   : > { %v4091_v32 = vsub.f32 %v1685_v27, %v1687_v29  ;;  %v1690_v34 = vpop.f32.mrb[22].mxu1  ;;  %v1940_v27 = vld [vmem:[#allocation16 + $0x50] sm:$0xff] }
 0x4e5   : > { %v1691_v40 = vadd.f32 %v1690_v34, %v1611_v31  ;;  %v1692_v36 = vpop.f32.mrb[23].mxu1  ;;  %v2617_v29 = vpack.c.bf16 %v1941_v28, %v1940_v27  ;;  %v1942_v34 = vld [vmem:[#allocation16 + $0x60] sm:$0xff] }
 0x4e6   : > { %v1693_v38 = vadd.f32 %v1692_v36, %v1615_v26  ;;  %v1739_v43 = vmul.f32 %v4091_v32, %v4091_v32 }
 0x4e8   : > { %v4095_v44 = vsub.f32 %v1691_v40, %v1693_v38  ;;  %v1696_v42 = vpop.f32.mrb[24].mxu1  ;;  %2397 = vmatprep.mubr.f32.mxu1 %v1739_v43  ;;  %v1943_v40 = vld [vmem:[#allocation16 + $0x68] sm:$0xff]  ;;  %v1944_v38 = vld [vmem:[#allocation16 + $0x70] sm:$0xff]  ;;  %v1945_v43 = vld [vmem:[#allocation16 + $0x78] sm:$0xff] }
 0x4e9   : > { %v1697_v37 = vadd.f32 %v1696_v42, %v1611_v31  ;;  %v1698_v63 = vpop.f32.mrb[25].mxu1  ;;  %v2621_v36 = vpack.c.bf16 %v1943_v40, %v1942_v34  ;;  %v2625_v42 = vpack.c.bf16 %v1945_v43, %v1944_v38 }
 0x4ea   : > { %v1740_v39 = vmul.f32 %v4095_v44, %v4095_v44  ;;  %v1699_v47 = vadd.f32 %v1698_v63, %v1615_v26 }
 0x4ec   : > { %v4099_v49 = vsub.f32 %v1697_v37, %v1699_v47  ;;  %v1702_v48 = vpop.f32.mrb[26].mxu1  ;;  %2398 = vmatmul.mubr.f32.vlgmr.msra.gmra.mrb[36].mxu1 %v1740_v39 }
 0x4ed   : > { %v1703_v55 = vadd.f32 %v1702_v48, %v1611_v31  ;;  %v1704_v50 = vpop.f32.mrb[27].mxu1 }
 0x4ee   : > { %v1705_v53 = vadd.f32 %v1704_v50, %v1615_v26  ;;  %v1741_v51 = vmul.f32 %v4099_v49, %v4099_v49 }
 0x4f0   : > { %v4103_v56 = vsub.f32 %v1703_v55, %v1705_v53  ;;  %v1708_v24 = vpop.f32.mrb[28].mxu1  ;;  %2400 = vmatprep.mubr.f32.mxu1 %v1741_v51 }
 0x4f1   : > { %v1709_v30 = vadd.f32 %v1708_v24, %v1611_v31  ;;  %v1710_v60 = vpop.f32.mrb[29].mxu1  ;;  %v2308_v24 = vld [vmem:[%s4261_s28] ss:$0 sm:$0xff]  ;;  %s3144_s28 = scalar_lea.vmem %s4144_s6, 1024 }
 0x4f2   : > { %v1711_v1 = vadd.f32 %v1710_v60, %v1615_v26  ;;  %v1742_v54 = vmul.f32 %v4103_v56, %v4103_v56  ;;  %p3145_p1 = scmp.ne.s32.totalorder %s4144_s6, %s3144_s28  ;;  %p3152_p2 = scmp.lt.s32.totalorder %s3150_s7, %s3144_s28 }
 0x4f4   : > { %v4107_v59 = vsub.f32 %v1709_v30, %v1711_v1  ;;  %v1714_v62 = vpop.f32.mrb[30].mxu1  ;;  %2401 = vmatmul.mubr.f32.gmra.mrb[38].mxu1 %v1742_v54  ;;  %v2309_v54 = vld [vmem:[#allocation14] ss:$0 sm:$0xff]  ;;  %p3146_p9 = pnand %p3145_p1, %p4263_p3  ;;  %p3153_p8 = por %p3152_p2, %p3151_p0 }
 0x4f5   : > { %v1715_v2 = vadd.f32 %v1714_v62, %v1611_v31  ;;  %v1716_v46 = vpop.f32.mrb[31].mxu1 }
 0x4f6   : > { %v1717_v5 = vadd.f32 %v1716_v46, %v1615_v26  ;;  %v1743_v52 = vmul.f32 %v4107_v59, %v4107_v59  ;;  %p3147_p13 = pneg %p3146_p9 }
 0x4f8   : > { %v4111_v45 = vsub.f32 %v1715_v2, %v1717_v5  ;;  %v1720_v14 = vpop.f32.mrb[32].mxu1  ;;  %2403 = vmatprep.mubr.f32.mxu1 %v1743_v52  ;;  %p3154_p10 = pnand %p3153_p8, %p3147_p13 }
 0x4f9   : > { %v1721_v6 = vadd.f32 %v1720_v14, %v1611_v31  ;;  %v1722_v61 = vpop.f32.mrb[33].mxu1 }
 0x4fa   : > { %v1723_v11 = vadd.f32 %v1722_v61, %v1615_v26  ;;  %v1744_v3 = vmul.f32 %v4111_v45, %v4111_v45 }
 0x4fc   : > { %v4115_v4 = vsub.f32 %v1721_v6, %v1723_v11  ;;  %v1726_v0 = vpop.f32.mrb[34].mxu1  ;;  %2404 = vmatmul.mubr.f32.gmra.mrb[40].mxu1 %v1744_v3 }
 0x4fd   : > { %v1727_v7 = vadd.f32 %v1726_v0, %v1611_v31  ;;  %v1728_v16 = vpop.f32.mrb[35].mxu1  ;;  %v1938_v31 = vld [vmem:[#allocation16 + $0x40] sm:$0xff] }
 0x4fe   : > { %v1729_v18 = vadd.f32 %v1728_v16, %v1615_v26  ;;  %v1745_v12 = vmul.f32 %v4115_v4, %v4115_v4  ;;  %v1939_v26 = vld [vmem:[#allocation16 + $0x48] sm:$0xff] }
 0x4ff   : > { %v2613_v41 = vpack.c.bf16 %v1939_v26, %v1938_v31 }
 0x500   : > { %v4119_v15 = vsub.f32 %v1727_v7, %v1729_v18  ;;  %2406 = vmatprep.mubr.f32.mxu1 %v1745_v12 }
 0x501   : > { %2614 = vmatprep.subr.bf16.mxu0 %v2613_v41 }
 0x502   : > { %v1746_v17 = vmul.f32 %v4119_v15, %v4119_v15  ;;  %2616 = vmatpush3.bf16.msra.mxu0 %v2613_v41 }
 0x503   : > { %2618 = vmatprep.subr.bf16.mxu0 %v2617_v29 }
 0x504   : > { %2407 = vmatmul.mubr.f32.gmra.mrb[42].mxu1 %v1746_v17 }
 0x506   : > { %2620 = vmatpush3.bf16.msra.mxu0 %v2617_v29 }
 0x507   : > { %2622 = vmatprep.subr.bf16.mxu0 %v2621_v36 }
 0x50a   : > { %2624 = vmatpush3.bf16.msra.mxu0 %v2621_v36 }
 0x50b   : > { %2626 = vmatprep.subr.bf16.mxu0 %v2625_v42 }
 0x50e   : > { %2628 = vmatpush3.bf16.msra.mxu0 %v2625_v42 }
 0x5bf   : > { %v2399_v37 = vpop.f32.mrb[36].mxu1 }
 0x5c0   : > { %v1835_v63 = vadd.f32 1e-05, %v2399_v37  ;;  %v1829_v39 = vpop.f32.mrb[37].mxu1 }
 0x5c1   : > { %v1830_v47 = vadd.f32 1e-05, %v1829_v39 }
 0x5c2   : > { %2818 = vrsqrt.f32 %v1835_v63 }
 0x5c3   : > { %2820 = vrsqrt.f32 %v1830_v47 }
 0x5c7   : > { %v2402_v48 = vpop.f32.mrb[38].mxu1 }
 0x5c8   : > { %v1845_v55 = vadd.f32 1e-05, %v2402_v48  ;;  %v1839_v50 = vpop.f32.mrb[39].mxu1 }
 0x5c9   : > { %v1840_v53 = vadd.f32 1e-05, %v1839_v50 }
 0x5ca   : > { %2822 = vrsqrt.f32 %v1845_v55 }
 0x5cb   : > { %2824 = vrsqrt.f32 %v1840_v53 }
 0x5cc   : > { %v2819_v51 = vpop.eup %2818 }
 0x5cd   : > { %v2821_v30 = vpop.eup %2820  ;;  %v1877_v60 = vmul.f32 %v2819_v51, %v4095_v44 }
 0x5ce   : > { %v1876_v1 = vmul.f32 %v2821_v30, %v4091_v32 }
 0x5cf   : > { %v1892_v62 = vmul.f32 %v2308_v24, %v1877_v60  ;;  %v2405_v2 = vpop.f32.mrb[40].mxu1 }
 0x5d0   : > { %v1855_v46 = vadd.f32 1e-05, %v2405_v2  ;;  %v1849_v5 = vpop.f32.mrb[41].mxu1  ;;  %v1891_v52 = vmul.f32 %v2308_v24, %v1876_v1 }
 0x5d1   : > { %v1850_v14 = vadd.f32 1e-05, %v1849_v5  ;;  %v1907_v6 = vadd.f32 %v2309_v54, %v1892_v62 }
 0x5d2   : > { %2826 = vrsqrt.f32 %v1855_v46  ;;  %v1906_v61 = vadd.f32 %v2309_v54, %v1891_v52 }
 0x5d3   : > { %2828 = vrsqrt.f32 %v1850_v14  ;;  %v1915_v11 = vadd.f32 %v1907_v6, %v4004_v57 }
 0x5d4   : > { %v2823_v3 = vpop.eup %2822  ;;  %v1914_v0 = vadd.f32 %v1906_v61, %v3989_v35 }
 0x5d5   : > { %v2825_v7 = vpop.eup %2824  ;;  %v1879_v44 = vmul.f32 %v2823_v3, %v4103_v56  ;;  %v1923_v12 = vmax.f32 %v1915_v11, 0.0 }
 0x5d6   : > { %v1922_v32 = vmax.f32 %v1914_v0, 0.0  ;;  %v1878_v16 = vmul.f32 %v2825_v7, %v4099_v49 }
 0x5d7   : > { %v2408_v18 = vpop.f32.mrb[42].mxu1  ;;  %v1894_v17 = vmul.f32 %v2308_v24, %v1879_v44 }
 0x5d8   : > { %v1865_v19 = vadd.f32 1e-05, %v2408_v18  ;;  %v1859_v20 = vpop.f32.mrb[43].mxu1  ;;  %2441 = vmatprep.mubr.f32.mxu0 %v1922_v32  ;;  %v1893_v22 = vmul.f32 %v2308_v24, %v1878_v16 }
 0x5d9   : > { %v1860_v23 = vadd.f32 1e-05, %v1859_v20  ;;  %2442 = vmatmul.mubr.f32.vlgmr.msra.gmra.mrb[32].mxu0 %v1923_v12  ;;  %v1909_v25 = vadd.f32 %v2309_v54, %v1894_v17 }
 0x5da   : > { %2830 = vrsqrt.f32 %v1865_v19  ;;  %v1908_v57 = vadd.f32 %v2309_v54, %v1893_v22 }
 0x5db   : > { %2832 = vrsqrt.f32 %v1860_v23  ;;  %v1917_v35 = vadd.f32 %v1909_v25, %v4034_v33 }
 0x5dc   : > { %v2827_v21 = vpop.eup %2826  ;;  %v1916_v56 = vadd.f32 %v1908_v57, %v4019_v13 }
 0x5dd   : > { %v2829_v31 = vpop.eup %2828  ;;  %v1881_v49 = vmul.f32 %v2827_v21, %v4111_v45  ;;  %v1925_v27 = vmax.f32 %v1917_v35, 0.0 }
 0x5de   : > { %v1924_v26 = vmax.f32 %v1916_v56, 0.0  ;;  %v1880_v41 = vmul.f32 %v2829_v31, %v4107_v59 }
 0x5df   : > { %v1896_v28 = vmul.f32 %v2308_v24, %v1881_v49 }
 0x5e0   : > { %2444 = vmatprep.mubr.f32.mxu0 %v1924_v26  ;;  %v1895_v29 = vmul.f32 %v2308_v24, %v1880_v41 }
 0x5e1   : > { %2445 = vmatmul.mubr.f32.gmra.mrb[34].mxu0 %v1925_v27  ;;  %v1911_v34 = vadd.f32 %v2309_v54, %v1896_v28 }
 0x5e2   : > { %v1910_v40 = vadd.f32 %v2309_v54, %v1895_v29 }
 0x5e3   : > { %v1919_v36 = vadd.f32 %v1911_v34, %v4052_v58 }
 0x5e4   : > { %v2831_v38 = vpop.eup %2830  ;;  %v1918_v33 = vadd.f32 %v1910_v40, %v4043_v9 }
 0x5e5   : > { %v2833_v43 = vpop.eup %2832  ;;  %v1883_v13 = vmul.f32 %v2831_v38, %v4119_v15  ;;  %v1927_v59 = vmax.f32 %v1919_v36, 0.0  ;;  %v2310_v15 = vld [vmem:[#allocation17] ss:$0 sm:$0xff] }
 0x5e6   : > { %v1926_v45 = vmax.f32 %v1918_v33, 0.0  ;;  %v1882_v42 = vmul.f32 %v2833_v43, %v4115_v4 }
 0x5e7   : > { %v1898_v37 = vmul.f32 %v2308_v24, %v1883_v13 }
 0x5e8   : > { %2447 = vmatprep.mubr.f32.mxu0 %v1926_v45  ;;  %v1897_v63 = vmul.f32 %v2308_v24, %v1882_v42 }
 0x5e9   : > { %2448 = vmatmul.mubr.f32.gmra.mrb[36].mxu0 %v1927_v59  ;;  %v1913_v39 = vadd.f32 %v2309_v54, %v1898_v37 }
 0x5ea   : > { %v1912_v47 = vadd.f32 %v2309_v54, %v1897_v63 }
 0x5eb   : > { %v1921_v48 = vadd.f32 %v1913_v39, %v4069_v10 }
 0x5ec   : > { %v1920_v58 = vadd.f32 %v1912_v47, %v4061_v8 }
 0x5ed   : > { %v1929_v9 = vmax.f32 %v1921_v48, 0.0 }
 0x5ee   : > { %v1928_v55 = vmax.f32 %v1920_v58, 0.0 }
 0x5f0   : > { %2450 = vmatprep.mubr.f32.mxu0 %v1928_v55 }
 0x5f1   : > { %2451 = vmatmul.mubr.f32.gmra.mrb[38].mxu0 %v1929_v9 }
 0x6ac   : > { %v2443_v50 = vpop.f32.mrb[32].mxu0 }
 0x6ad   : > { %v2025_v53 = vadd.f32 %v2443_v50, %v2310_v15  ;;  %v2019_v4 = vpop.f32.mrb[33].mxu0 }
 0x6ae   : > { %v2020_v51 = vadd.f32 %v2310_v15, %v2019_v4 }
 0x6af   : > { %2059 = vst [vmem:[%s683_s10 + $0x8] sm:$0xff] %v2025_v53 }
 0x6b0   : > { %2058 = vst [vmem:[%s683_s10] sm:$0xff] %v2020_v51 }
 0x6b4   : > { %v2446_v24 = vpop.f32.mrb[34].mxu0 }
 0x6b5   : > { %v2035_v30 = vadd.f32 %v2446_v24, %v2310_v15  ;;  %v2029_v60 = vpop.f32.mrb[35].mxu0 }
 0x6b6   : > { %v2030_v10 = vadd.f32 %v2310_v15, %v2029_v60 }
 0x6b7   : > { %2061 = vst [vmem:[%s683_s10 + $0x18] sm:$0xff] %v2035_v30 }
 0x6b8   : > { %2060 = vst [vmem:[%s683_s10 + $0x10] sm:$0xff] %v2030_v10 }
 0x6bc   : > { %v2449_v8 = vpop.f32.mrb[36].mxu0 }
 0x6bd   : > { %v2045_v1 = vadd.f32 %v2449_v8, %v2310_v15  ;;  %v2039_v54 = vpop.f32.mrb[37].mxu0 }
 0x6be   : > { %v2040_v62 = vadd.f32 %v2310_v15, %v2039_v54 }
 0x6bf   : > { %2063 = vst [vmem:[%s683_s10 + $0x28] sm:$0xff] %v2045_v1 }
 0x6c0   : > { %2062 = vst [vmem:[%s683_s10 + $0x20] sm:$0xff] %v2040_v62 }
 0x6c4   : > { %v2452_v2 = vpop.f32.mrb[38].mxu0 }
 0x6c5   : > { %v2055_v46 = vadd.f32 %v2452_v2, %v2310_v15  ;;  %v2049_v5 = vpop.f32.mrb[39].mxu0 }
 0x6c6   : > { %v2050_v52 = vadd.f32 %v2310_v15, %v2049_v5 }
 0x6c7   : > { %2065 = vst [vmem:[%s683_s10 + $0x38] sm:$0xff] %v2055_v46 }
 0x6c8   : > { %2064 = vst [vmem:[%s683_s10 + $0x30] sm:$0xff] %v2050_v52 }
 0x6c9   : > { %3157 = shalt.err (!%p3154_p10)
}
 0x6ca   : > { %s3158_s10 = scalar_lea.hbm %s4149_s4, 1024  ;;  %s3162_s1 = scalar_lea.hbm %s4262_s0, 2048 }
 0x6cb   : > { %p3159_p11 = scmp.ne.s32.totalorder %s4149_s4, %s3158_s10  ;;  %p3163_p5 = scmp.lt.u32.totalorder %s4149_s4, %s4262_s0 }
 0x6cc   : > { %p3164_p7 = scmp.lt.u32.totalorder %s3162_s1, %s3158_s10  ;;  %p3166_p1 = scmp.lt.u32.totalorder %s3158_s10, %s4149_s4 }
 0x6cd   : > { %p3160_p6 = pnand %p3159_p11, %p4263_p3 }
 0x6ce   : > { %p3165_p4 = por %p3164_p7, %p3163_p5 }
 0x6cf   : > { %p3161_p12 = pneg %p3160_p6 }
 0x6d0   : > { %p3167_p9 = por %p3166_p1, %p3165_p4 }
 0x6d2   : > { %p3168_p13 = pnand %p3167_p9, %p3161_p12 }
 0x6d4   : > { %3171 = shalt.err (!%p3168_p13)
}
 0x6d5   : > { %s3250_s7 = smov 128   ;;  %s3251_s28 = smov 8  }
 0x6d6   : > { %2671 = dma.vmem_to_hbm [thread:$0]  (%p4263_p3), %s4144_s6, 1024, %s4149_s4, %s2067_s18, %s3250_s7, %s3250_s7, %s3251_s28  }
 0x6d7 PF: > { %s2095_s2 = sand.u32 1, %s3218_s21   ;;  %p4264_p0 = scmp.ne.s32.totalorder %s4242_s3, 0 }
 0x6d8   : > { %p4265_p2 = scmp.ge.s32.totalorder %s3230_s24, 2  ;;  %s2096_s10 = scalar_lea.sflag [#allocation4], %s2095_s2 }
 0x6da   : > { %p2709_p8 = pnand %p4265_p2, %p4264_p0 }
 0x6dc   : > { %3213 = dma.done.wait (!%p2709_p8), %s2096_s10, 1024  }
 0x6dd   : > { %3215 = vsyncadd (!%p2709_p8), %s2096_s10, 4294966272  ;;  %p34_p10 = scmp.ge.s32.totalorder %s3584_s29, 4   ;;  %s4266_s21 = smov %s3222_s22 }
 0x6de   : > { %s4267_s22 = smov %s3226_s23  ;;  %s4268_s23 = smov %s3595_s15 }
 0x6df   : > { %s4269_s24 = smov %s3584_s29  ;;  %36 = sbr.rel (!%p34_p10) target bundleno = 22 (0x16), region = 172 }
 0x6e6   :  { %2101 = vsyncpa [#allocation3], 1 }
 0x6e7   :  { %2103 = vsyncpa [#allocation3 + $0x1], 1 }
 0x6e8   :  { %2104 = vsyncpa [#allocation6], 1 }
 0x6e9   :  { %2105 = vsyncpa [#allocation9], 1 }
 0x6ea   :  { %2106 = vsyncpa [#allocation12], 1 }
 0x6eb   :  { %2107 = vsyncpa [#allocation15], 1 }
 0x6ec   :  { %2108 = vsyncpa [#allocation18], 1 }
 0x6ed   :  { %2109 = vsyncpa [#allocation4], 1 }
 0x6ee   :  { %2111 = vsyncpa [#allocation4 + $0x1], 1 }

</bundles_post_ra>
